<compile_context>
chip_gen: v5e
topology: v5e:2x2
jax: 0.10.0
libtpu: 0.0.40
codegen_flags: <defaults>
</compile_context>

<pallas_src>
import functools

import jax
import jax.numpy as jnp
from jax.experimental import pallas as pl
from jax.experimental.pallas import tpu as pltpu


# --------------------------------------------------------------------------- helpers

def _layernorm(x, w, b, eps=1e-5):
    # x: (M, E) f32 ; w, b: (1, E) f32
    mu = jnp.mean(x, axis=-1, keepdims=True)
    var = jnp.mean((x - mu) ** 2, axis=-1, keepdims=True)
    return (x - mu) * jax.lax.rsqrt(var + eps) * w + b


@functools.lru_cache(maxsize=1)
def _vmem_capacity_bytes():
    """Physical per-core VMEM bytes, or None if it cannot be queried."""
    try:
        return int(pltpu.get_tpu_info().vmem_capacity_bytes)
    except Exception:
        return None


def _vmem_limit_bytes():
    cap = _vmem_capacity_bytes()
    if cap is None:
        return 64 * 1024 * 1024            # safe on every generation
    # ~48 MiB on v7x (64 MiB physical), ~96 MiB on v5e/v6e (128 MiB physical).
    return max(32 * 1024 * 1024, min(int(0.75 * cap), cap - 8 * 1024 * 1024))


def _pick_batch_tile(n):
    cap = _vmem_capacity_bytes()
    desired = 2 if (cap is None or cap <= 64 * 1024 * 1024) else 4
    for t in range(min(desired, n), 0, -1):
        if n % t == 0:
            return t
    return 1


@functools.lru_cache(maxsize=1)
def _single_buffer_weights_supported():
    """Cached one-time probe: does this jax/libtpu accept pl.Buffered(1) block specs?

    Runs a tiny throwaway kernel once per process; the real kernel is then built a
    single time with the right setting (no silent doubled-VMEM retry of the big call).
    """
    try:
        def probe(x_ref, w_ref, o_ref):
            o_ref[...] = x_ref[...] + w_ref[...]

        fn = pl.pallas_call(
            probe,
            out_shape=jax.ShapeDtypeStruct((8, 128), jnp.float32),
            grid=(1,),
            in_specs=[pl.BlockSpec((8, 128), lambda i: (0, 0)),
                      pl.BlockSpec((8, 128), lambda i: (0, 0),
                                   pipeline_mode=pl.Buffered(1))],
            out_specs=pl.BlockSpec((8, 128), lambda i: (0, 0)),
        )
        jax.block_until_ready(
            fn(jnp.zeros((8, 128), jnp.float32), jnp.ones((8, 128), jnp.float32)))
        return True
    except Exception:
        return False


# ---------------------------------------------------------------------------- kernel

def _residual_block_kernel(
    x_ref,                          # (B_TILE, L, E) activations
    ln1_w_ref, ln1_b_ref,           # (1, E) f32
    wqkv_ref, bqkv_ref,             # (E, 3E) bf16 (pre-transposed, Q-scaled), (1, 3E) f32
    wout_ref, bout_ref,             # (E, E) bf16 (pre-transposed), (1, E) f32
    ln2_w_ref, ln2_b_ref,           # (1, E) f32
    wfc_ref, bfc_ref,               # (E, 4E) bf16 (pre-transposed), (1, 4E) f32
    wproj_ref, bproj_ref,           # (4E, E) bf16 (pre-transposed), (1, E) f32
    o_ref,                          # (B_TILE, L, E) output
    q_sc, k_sc, v_sc,               # VMEM scratch (B_TILE*H, L, HD) bf16
    attn_sc,                        # VMEM scratch (B_TILE*L, E) bf16
    *, n_head: int,
):
    f32 = jnp.float32
    cdt = wqkv_ref.dtype            # bf16 compute dtype for the MXU

    B, L, E = x_ref.shape
    H = n_head
    HD = E // H

    # Flatten the batch tile so every projection GEMM has M = B_TILE*L rows.
    x = x_ref[...].reshape(B * L, E).astype(f32)

    # ------------- attention branch: x + out_proj(MHA(LN1(x))) -------------
    h = _layernorm(x, ln1_w_ref[...], ln1_b_ref[...])
    qkv = jnp.dot(h.astype(cdt), wqkv_ref[...],
                  preferred_element_type=f32) + bqkv_ref[...]            # (B*L, 3E) f32
    # 1/sqrt(HD) already folded into the Q columns of wqkv/bqkv at prepare time.
    q = qkv[:, 0 * E:1 * E]
    k = qkv[:, 1 * E:2 * E]
    v = qkv[:, 2 * E:3 * E]

    # Head-major packing via static slab writes into VMEM scratch (no stack/concat).
    for b in range(B):
        rows = slice(b * L, (b + 1) * L)
        for hh in range(H):
            cols = slice(hh * HD, (hh + 1) * HD)
            g = b * H + hh
            q_sc[g] = q[rows, cols].astype(cdt)
            k_sc[g] = k[rows, cols].astype(cdt)
            v_sc[g] = v[rows, cols].astype(cdt)

    # TODO(synk): additive attn_mask support goes here (attn_mask=None in this config).
    # TODO(synk): for very long sequences on v7x (64 MiB VMEM), tile this over query
    #             blocks (flash-style) so the (B*H, L, L) scores never fully materialize.
    s = jnp.einsum("gqd,gkd->gqk", q_sc[...], k_sc[...],
                   preferred_element_type=f32)                           # (B*H, L, L) f32
    s = s - jnp.max(s, axis=-1, keepdims=True)
    e = jnp.exp(s)
    denom = jnp.sum(e, axis=-1, keepdims=True)                           # f32 row sums
    o3 = jnp.einsum("gqk,gkd->gqd", e.astype(cdt), v_sc[...],
                    preferred_element_type=f32)                          # (B*H, L, HD)
    # Normalize the (much smaller) PV output instead of the probabilities.
    o3 = o3 * pl.reciprocal(denom, approx=True)

    # Re-pack heads back into (B*L, E) bf16 via static slab writes.
    for b in range(B):
        rows = slice(b * L, (b + 1) * L)
        for hh in range(H):
            cols = slice(hh * HD, (hh + 1) * HD)
            attn_sc[rows, cols] = o3[b * H + hh].astype(cdt)

    attn = jnp.dot(attn_sc[...], wout_ref[...],
                   preferred_element_type=f32) + bout_ref[...]
    x = x + attn

    # ------------- MLP branch: x + c_proj(QuickGELU(c_fc(LN2(x)))) -------------
    h2 = _layernorm(x, ln2_w_ref[...], ln2_b_ref[...])
    fc = jnp.dot(h2.astype(cdt), wfc_ref[...],
                 preferred_element_type=f32) + bfc_ref[...]              # (B*L, 4E)
    fc = fc * jax.nn.sigmoid(1.702 * fc)                                 # QuickGELU (f32)
    mlp = jnp.dot(fc.astype(cdt), wproj_ref[...],
                  preferred_element_type=f32) + bproj_ref[...]

    o_ref[...] = (x + mlp).reshape(B, L, E).astype(o_ref.dtype)


# ------------------------------------------------------------------------- call site

def _weight_order(prep):
    return (prep["ln1_w"], prep["ln1_b"],
            prep["wqkv"], prep["bqkv"],
            prep["wout"], prep["bout"],
            prep["ln2_w"], prep["ln2_b"],
            prep["wfc"], prep["bfc"],
            prep["wproj"], prep["bproj"])


@functools.lru_cache(maxsize=None)
def _build_block_fn(n, l, e, n_head, b_tile, x_dtype_name, w_dtype_name):
    xdt = jnp.dtype(x_dtype_name)
    wdt = jnp.dtype(w_dtype_name)
    H = n_head
    HD = e // H

    single_buf = _single_buffer_weights_supported()

    def wspec(shape):
        # Weights are grid-invariant: one VMEM copy suffices when supported.
        kwargs = {"pipeline_mode": pl.Buffered(1)} if single_buf else {}
        return pl.BlockSpec(shape, lambda b: (0, 0), **kwargs)

    weight_shapes = [
        (1, e), (1, e),             # ln1 w, b
        (e, 3 * e), (1, 3 * e),     # wqkv, bqkv
        (e, e), (1, e),             # wout, bout
        (1, e), (1, e),             # ln2 w, b
        (e, 4 * e), (1, 4 * e),     # wfc, bfc
        (4 * e, e), (1, e),         # wproj, bproj
    ]
    in_specs = [pl.BlockSpec((b_tile, l, e), lambda b: (b, 0, 0))]
    in_specs += [wspec(s) for s in weight_shapes]

    # Advisory cost hint so XLA schedules neighbors around this long custom call.
    flops = n * (24 * l * e * e + 4 * l * l * e)
    transcendentals = n * (H * l * l + H * l + 4 * l * e + 2 * l)
    weight_bytes = sum(int(a) * int(b) for a, b in weight_shapes) * wdt.itemsize
    bytes_accessed = 2 * n * l * e * xdt.itemsize + weight_bytes
    cost = pl.CostEstimate(flops=flops, transcendentals=transcendentals,
                           bytes_accessed=bytes_accessed)

    fn = pl.pallas_call(
        functools.partial(_residual_block_kernel, n_head=n_head),
        out_shape=jax.ShapeDtypeStruct((n, l, e), xdt),
        grid_spec=pltpu.PrefetchScalarGridSpec(
            num_scalar_prefetch=0,
            grid=(n // b_tile,),
            in_specs=in_specs,
            out_specs=pl.BlockSpec((b_tile, l, e), lambda b: (b, 0, 0)),
            scratch_shapes=[
                pltpu.VMEM((b_tile * H, l, HD), wdt),   # q (head-major)
                pltpu.VMEM((b_tile * H, l, HD), wdt),   # k
                pltpu.VMEM((b_tile * H, l, HD), wdt),   # v
                pltpu.VMEM((b_tile * l, e), wdt),       # re-packed attention output
            ],
        ),
        compiler_params=pltpu.CompilerParams(
            dimension_semantics=("parallel",),
            vmem_limit_bytes=_vmem_limit_bytes(),
        ),
        cost_estimate=cost,
    )
    return jax.jit(fn)


def residual_attention_block_batch_first(xb, prep, n_head):
    """Preferred entry point. xb: (N, L, E) batch-first; no HBM transposes, no host sync."""
    n, l, e = xb.shape
    b_tile = _pick_batch_tile(n)
    fn = _build_block_fn(n, l, e, n_head, b_tile,
                         jnp.dtype(xb.dtype).name, jnp.dtype(prep["wqkv"].dtype).name)
    return fn(xb, *_weight_order(prep))


def residual_attention_block(x, prep, n_head):
    """PyTorch-layout compatibility shim: x is (L, N, E) like nn.MultiheadAttention
    (batch_first=False). Prefer the batch-first entry point above."""
    xb = jnp.transpose(x, (1, 0, 2))
    out = residual_attention_block_batch_first(xb, prep, n_head)
    return jnp.transpose(out, (1, 0, 2))


# ------------------------------------------------------------------------- parameters

def prepare_params(p, n_head, compute_dtype=jnp.bfloat16):
    """One-time (load-time) repack of PyTorch-layout params: pre-transpose every weight
    matrix (lane-major RHS, no in-kernel .T), fold 1/sqrt(head_dim) into the Q columns
    of the packed QKV projection, and cast weights to bf16 (f32 accumulation retained
    inside the kernel)."""
    f32 = jnp.float32
    in_proj_w = jnp.asarray(p["in_proj_w"], f32)                # (3E, E)
    e = in_proj_w.shape[1]
    hd = e // n_head
    scale = 1.0 / (hd ** 0.5)
    wqkv = in_proj_w.T                                          # (E, 3E)
    wqkv = wqkv.at[:, :e].multiply(scale)                       # fold q scale
    bqkv = jnp.asarray(p["in_proj_b"], f32)
    bqkv = bqkv.at[:, :e].multiply(scale)
    return {
        "ln1_w": jnp.asarray(p["ln1_w"], f32), "ln1_b": jnp.asarray(p["ln1_b"], f32),
        "wqkv": wqkv.astype(compute_dtype),                     # (E, 3E)
        "bqkv": bqkv,                                           # (1, 3E) f32
        "wout": jnp.asarray(p["out_proj_w"], f32).T.astype(compute_dtype),  # (E, E)
        "bout": jnp.asarray(p["out_proj_b"], f32),              # (1, E)
        "ln2_w": jnp.asarray(p["ln2_w"], f32), "ln2_b": jnp.asarray(p["ln2_b"], f32),
        "wfc": jnp.asarray(p["fc_w"], f32).T.astype(compute_dtype),         # (E, 4E)
        "bfc": jnp.asarray(p["fc_b"], f32),                     # (1, 4E)
        "wproj": jnp.asarray(p["proj_w"], f32).T.astype(compute_dtype),     # (4E, E)
        "bproj": jnp.asarray(p["proj_b"], f32),                 # (1, E)
    }


def init_params(key, d_model):
    """PyTorch-layout parameters (same shapes as the nn.Module's state dict)."""
    E = d_model
    ks = jax.random.split(key, 8)
    s = 0.05
    return {
        "ln1_w": jnp.ones((1, E), jnp.float32),
        "ln1_b": jnp.zeros((1, E), jnp.float32),
        "in_proj_w": s * jax.random.normal(ks[0], (3 * E, E), jnp.float32),
        "in_proj_b": s * jax.random.normal(ks[1], (1, 3 * E), jnp.float32),
        "out_proj_w": s * jax.random.normal(ks[2], (E, E), jnp.float32),
        "out_proj_b": s * jax.random.normal(ks[3], (1, E), jnp.float32),
        "ln2_w": jnp.ones((1, E), jnp.float32),
        "ln2_b": jnp.zeros((1, E), jnp.float32),
        "fc_w": s * jax.random.normal(ks[4], (4 * E, E), jnp.float32),
        "fc_b": s * jax.random.normal(ks[5], (1, 4 * E), jnp.float32),
        "proj_w": s * jax.random.normal(ks[6], (E, 4 * E), jnp.float32),
        "proj_b": s * jax.random.normal(ks[7], (1, E), jnp.float32),
    }


def reference_forward(x, p, n_head):
    """Pure-JAX f32 reference matching PyTorch semantics (attn_mask=None)."""
    L, N, E = x.shape
    HD = E // n_head

    def ln(v, w, b):
        mu = jnp.mean(v, -1, keepdims=True)
        var = jnp.mean((v - mu) ** 2, -1, keepdims=True)
        return (v - mu) * jax.lax.rsqrt(var + 1e-5) * w[0] + b[0]

    h = ln(x, p["ln1_w"], p["ln1_b"])
    qkv = jnp.einsum("lne,fe->lnf", h, p["in_proj_w"]) + p["in_proj_b"][0]
    q, k, v = jnp.split(qkv, 3, axis=-1)
    q = q.reshape(L, N, n_head, HD) / (HD ** 0.5)
    k = k.reshape(L, N, n_head, HD)
    v = v.reshape(L, N, n_head, HD)
    s = jnp.einsum("qnhd,knhd->nhqk", q, k)
    pattn = jax.nn.softmax(s, axis=-1)
    o = jnp.einsum("nhqk,knhd->qnhd", pattn, v).reshape(L, N, E)
    attn = jnp.einsum("lne,fe->lnf", o, p["out_proj_w"]) + p["out_proj_b"][0]
    x = x + attn
    h2 = ln(x, p["ln2_w"], p["ln2_b"])
    fc = jnp.einsum("lne,fe->lnf", h2, p["fc_w"]) + p["fc_b"][0]
    fc = fc * jax.nn.sigmoid(1.702 * fc)
    mlp = jnp.einsum("lnf,ef->lne", fc, p["proj_w"]) + p["proj_b"][0]
    return x + mlp


if __name__ == "__main__":
    L, N, E, H = 8, 2, 32, 4   # seq=8, batch=2, d_model=32, n_head=4
    key = jax.random.PRNGKey(0)
    kx, kp = jax.random.split(key)
    x = jax.random.normal(kx, (L, N, E), jnp.float32)   # PyTorch layout (L, N, E)
    params = init_params(kp, E)
    prep = prepare_params(params, H)                    # one-time weight repack

    # Preferred batch-first path: no HBM transposes around the kernel.
    xb = jnp.transpose(x, (1, 0, 2))
    out_bf = jax.block_until_ready(
        residual_attention_block_batch_first(xb, prep, H))

    # PyTorch-layout compatibility path.
    out = jax.block_until_ready(residual_attention_block(x, prep, H))

    ref = reference_forward(x, params, H)
    assert out.shape == (L, N, E)
    # bf16 matmuls (f32 accumulation) + approx reciprocal => loosened tolerance.
    assert jnp.allclose(out, ref, atol=3e-2, rtol=3e-2), (
        float(jnp.max(jnp.abs(out - ref))))
    assert jnp.allclose(jnp.transpose(out_bf, (1, 0, 2)), ref,
                        atol=3e-2, rtol=3e-2), (
        float(jnp.max(jnp.abs(jnp.transpose(out_bf, (1, 0, 2)) - ref))))
    print("KERNEL_OK")
</pallas_src>

<mosaic_0001>
module attributes {stable_mosaic.version = 11 : i64} {
  func.func @probe(%arg0: i32, %arg1: memref<8x128xf32, #tpu.memory_space<vmem>>, %arg2: memref<8x128xf32, #tpu.memory_space<vmem>>, %arg3: memref<8x128xf32, #tpu.memory_space<vmem>>) attributes {dimension_semantics = [#tpu.dimension_semantics<arbitrary>], iteration_bounds = array<i64: 1>, scalar_prefetch = 0 : i64, scratch_operands = 0 : i64, tpu.core_type = #tpu.core_type<tc>, window_params = [{pipeline_mode = #tpu.pipeline_mode<synchronous>, transform_indices = @transform_0, window_bounds = array<i64: 8, 128>}, {pipeline_mode = #tpu.pipeline_mode<synchronous>, transform_indices = @transform_1, window_bounds = array<i64: 8, 128>}, {pipeline_mode = #tpu.pipeline_mode<synchronous>, transform_indices = @transform_2, window_bounds = array<i64: 8, 128>}]} {
    %c0 = arith.constant 0 : index
    %c0_0 = arith.constant 0 : index
    %0 = vector.load %arg1[%c0, %c0_0] : memref<8x128xf32, #tpu.memory_space<vmem>>, vector<8x128xf32>
    %c0_1 = arith.constant 0 : index
    %c0_2 = arith.constant 0 : index
    %1 = vector.load %arg2[%c0_1, %c0_2] : memref<8x128xf32, #tpu.memory_space<vmem>>, vector<8x128xf32>
    %2 = arith.addf %0, %1 : vector<8x128xf32>
    %c0_3 = arith.constant 0 : index
    %c0_4 = arith.constant 0 : index
    %3 = vector.load %arg3[%c0_3, %c0_4] : memref<8x128xf32, #tpu.memory_space<vmem>>, vector<8x128xf32>
    tpu.vector_store %arg3[%c0_3, %c0_4], %2 {strides = array<i32>} : memref<8x128xf32, #tpu.memory_space<vmem>>, vector<8x128xf32>,
    return
  }
  func.func @transform_0(%arg0: i32) -> (i32, i32) {
    %c0_i32 = arith.constant 0 : i32
    %c0_i32_0 = arith.constant 0 : i32
    %c0_i32_1 = arith.constant 0 : i32
    return %c0_i32, %c0_i32_0 : i32, i32
  }
  func.func @transform_1(%arg0: i32) -> (i32, i32) {
    %c0_i32 = arith.constant 0 : i32
    %c0_i32_0 = arith.constant 0 : i32
    %c0_i32_1 = arith.constant 0 : i32
    return %c0_i32, %c0_i32_0 : i32, i32
  }
  func.func @transform_2(%arg0: i32) -> (i32, i32) {
    %c0_i32 = arith.constant 0 : i32
    %c0_i32_0 = arith.constant 0 : i32
    %c0_i32_1 = arith.constant 0 : i32
    return %c0_i32, %c0_i32_0 : i32, i32
  }
}

module attributes {stable_mosaic.version = 11 : i64} {
  func.func @_residual_block_kernel(%arg0: i32, %arg1: memref<2x8x32xf32, #tpu.memory_space<vmem>>, %arg2: memref<1x32xf32, #tpu.memory_space<vmem>>, %arg3: memref<1x32xf32, #tpu.memory_space<vmem>>, %arg4: memref<32x96xbf16, #tpu.memory_space<vmem>>, %arg5: memref<1x96xf32, #tpu.memory_space<vmem>>, %arg6: memref<32x32xbf16, #tpu.memory_space<vmem>>, %arg7: memref<1x32xf32, #tpu.memory_space<vmem>>, %arg8: memref<1x32xf32, #tpu.memory_space<vmem>>, %arg9: memref<1x32xf32, #tpu.memory_space<vmem>>, %arg10: memref<32x128xbf16, #tpu.memory_space<vmem>>, %arg11: memref<1x128xf32, #tpu.memory_space<vmem>>, %arg12: memref<128x32xbf16, #tpu.memory_space<vmem>>, %arg13: memref<1x32xf32, #tpu.memory_space<vmem>>, %arg14: memref<2x8x32xf32, #tpu.memory_space<vmem>>, %arg15: memref<8x8x8xbf16, #tpu.memory_space<vmem>>, %arg16: memref<8x8x8xbf16, #tpu.memory_space<vmem>>, %arg17: memref<8x8x8xbf16, #tpu.memory_space<vmem>>, %arg18: memref<16x32xbf16, #tpu.memory_space<vmem>>) attributes {dimension_semantics = [#tpu.dimension_semantics<parallel>], iteration_bounds = array<i64: 1>, scalar_prefetch = 0 : i64, scratch_operands = 4 : i64, tpu.core_type = #tpu.core_type<tc>, window_params = [{transform_indices = @transform_0, window_bounds = array<i64: 2, 8, 32>}, {pipeline_mode = #tpu.pipeline_mode<synchronous>, transform_indices = @transform_1, window_bounds = array<i64: 1, 32>}, {pipeline_mode = #tpu.pipeline_mode<synchronous>, transform_indices = @transform_2, window_bounds = array<i64: 1, 32>}, {pipeline_mode = #tpu.pipeline_mode<synchronous>, transform_indices = @transform_3, window_bounds = array<i64: 32, 96>}, {pipeline_mode = #tpu.pipeline_mode<synchronous>, transform_indices = @transform_4, window_bounds = array<i64: 1, 96>}, {pipeline_mode = #tpu.pipeline_mode<synchronous>, transform_indices = @transform_5, window_bounds = array<i64: 32, 32>}, {pipeline_mode = #tpu.pipeline_mode<synchronous>, transform_indices = @transform_6, window_bounds = array<i64: 1, 32>}, {pipeline_mode = #tpu.pipeline_mode<synchronous>, transform_indices = @transform_7, window_bounds = array<i64: 1, 32>}, {pipeline_mode = #tpu.pipeline_mode<synchronous>, transform_indices = @transform_8, window_bounds = array<i64: 1, 32>}, {pipeline_mode = #tpu.pipeline_mode<synchronous>, transform_indices = @transform_9, window_bounds = array<i64: 32, 128>}, {pipeline_mode = #tpu.pipeline_mode<synchronous>, transform_indices = @transform_10, window_bounds = array<i64: 1, 128>}, {pipeline_mode = #tpu.pipeline_mode<synchronous>, transform_indices = @transform_11, window_bounds = array<i64: 128, 32>}, {pipeline_mode = #tpu.pipeline_mode<synchronous>, transform_indices = @transform_12, window_bounds = array<i64: 1, 32>}, {transform_indices = @transform_13, window_bounds = array<i64: 2, 8, 32>}]} {
    %c0 = arith.constant 0 : index
    %c0_0 = arith.constant 0 : index
    %c0_1 = arith.constant 0 : index
    %0 = vector.load %arg1[%c0, %c0_0, %c0_1] : memref<2x8x32xf32, #tpu.memory_space<vmem>>, vector<2x8x32xf32>
    %1 = vector.shape_cast %0 : vector<2x8x32xf32> to vector<16x32xf32>
    %c0_2 = arith.constant 0 : index
    %c0_3 = arith.constant 0 : index
    %2 = vector.load %arg2[%c0_2, %c0_3] : memref<1x32xf32, #tpu.memory_space<vmem>>, vector<1x32xf32>
    %c0_4 = arith.constant 0 : index
    %c0_5 = arith.constant 0 : index
    %3 = vector.load %arg3[%c0_4, %c0_5] : memref<1x32xf32, #tpu.memory_space<vmem>>, vector<1x32xf32>
    %cst = arith.constant dense<0.000000e+00> : vector<16xf32>
    %4 = vector.multi_reduction <add>, %1, %cst [1] : vector<16x32xf32> to vector<16xf32>
    %5 = vector.shape_cast %4 : vector<16xf32> to vector<16x1xf32>
    %cst_6 = arith.constant 3.200000e+01 : f32
    %6 = vector.broadcast %cst_6 : f32 to vector<16x1xf32>
    %7 = arith.divf %5, %6 : vector<16x1xf32>
    %8 = vector.broadcast %7 : vector<16x1xf32> to vector<16x32xf32>
    %9 = arith.subf %1, %8 : vector<16x32xf32>
    %10 = arith.mulf %9, %9 : vector<16x32xf32>
    %cst_7 = arith.constant dense<0.000000e+00> : vector<16xf32>
    %11 = vector.multi_reduction <add>, %10, %cst_7 [1] : vector<16x32xf32> to vector<16xf32>
    %12 = vector.shape_cast %11 : vector<16xf32> to vector<16x1xf32>
    %cst_8 = arith.constant 3.200000e+01 : f32
    %13 = vector.broadcast %cst_8 : f32 to vector<16x1xf32>
    %14 = arith.divf %12, %13 : vector<16x1xf32>
    %15 = vector.broadcast %7 : vector<16x1xf32> to vector<16x32xf32>
    %16 = arith.subf %1, %15 : vector<16x32xf32>
    %cst_9 = arith.constant 9.99999974E-6 : f32
    %17 = vector.broadcast %cst_9 : f32 to vector<16x1xf32>
    %18 = arith.addf %14, %17 : vector<16x1xf32>
    %19 = math.rsqrt %18 : vector<16x1xf32>
    %20 = vector.broadcast %19 : vector<16x1xf32> to vector<16x32xf32>
    %21 = arith.mulf %16, %20 : vector<16x32xf32>
    %22 = vector.broadcast %2 : vector<1x32xf32> to vector<16x32xf32>
    %23 = arith.mulf %21, %22 : vector<16x32xf32>
    %24 = vector.broadcast %3 : vector<1x32xf32> to vector<16x32xf32>
    %25 = arith.addf %23, %24 : vector<16x32xf32>
    %26 = arith.truncf %25 : vector<16x32xf32> to vector<16x32xbf16>
    %c0_10 = arith.constant 0 : index
    %c0_11 = arith.constant 0 : index
    %27 = vector.load %arg4[%c0_10, %c0_11] : memref<32x96xbf16, #tpu.memory_space<vmem>>, vector<32x96xbf16>
    %cst_12 = arith.constant dense<0.000000e+00> : vector<16x96xf32>
    %28 = tpu.matmul %26, %27, %cst_12 {dimension_numbers = #tpu.dot_dimension_numbers<[1], [0], [0], [1], [0, 0, 1, 1], [], []>} : vector<16x32xbf16>, vector<32x96xbf16>, vector<16x96xf32> -> vector<16x96xf32>
    %c0_13 = arith.constant 0 : index
    %c0_14 = arith.constant 0 : index
    %29 = vector.load %arg5[%c0_13, %c0_14] : memref<1x96xf32, #tpu.memory_space<vmem>>, vector<1x96xf32>
    %30 = vector.broadcast %29 : vector<1x96xf32> to vector<16x96xf32>
    %31 = arith.addf %28, %30 : vector<16x96xf32>
    %32 = vector.extract_strided_slice %31 {offsets = [0, 0], sizes = [16, 32], strides = [1, 1]} : vector<16x96xf32> to vector<16x32xf32>
    %33 = vector.extract_strided_slice %31 {offsets = [0, 32], sizes = [16, 32], strides = [1, 1]} : vector<16x96xf32> to vector<16x32xf32>
    %34 = vector.extract_strided_slice %31 {offsets = [0, 64], sizes = [16, 32], strides = [1, 1]} : vector<16x96xf32> to vector<16x32xf32>
    %35 = vector.extract_strided_slice %32 {offsets = [0, 0], sizes = [8, 8], strides = [1, 1]} : vector<16x32xf32> to vector<8x8xf32>
    %36 = arith.truncf %35 : vector<8x8xf32> to vector<8x8xbf16>
    %c0_15 = arith.constant 0 : index
    %c0_16 = arith.constant 0 : index
    %c0_17 = arith.constant 0 : index
    %37 = vector.load %arg15[%c0_15, %c0_16, %c0_17] : memref<8x8x8xbf16, #tpu.memory_space<vmem>>, vector<1x8x8xbf16>
    %38 = vector.shape_cast %37 : vector<1x8x8xbf16> to vector<8x8xbf16>
    %39 = vector.shape_cast %36 : vector<8x8xbf16> to vector<1x8x8xbf16>
    tpu.vector_store %arg15[%c0_15, %c0_16, %c0_17], %39 {strides = array<i32>} : memref<8x8x8xbf16, #tpu.memory_space<vmem>>, vector<1x8x8xbf16>,
    %40 = vector.extract_strided_slice %33 {offsets = [0, 0], sizes = [8, 8], strides = [1, 1]} : vector<16x32xf32> to vector<8x8xf32>
    %41 = arith.truncf %40 : vector<8x8xf32> to vector<8x8xbf16>
    %c0_18 = arith.constant 0 : index
    %c0_19 = arith.constant 0 : index
    %c0_20 = arith.constant 0 : index
    %42 = vector.load %arg16[%c0_18, %c0_19, %c0_20] : memref<8x8x8xbf16, #tpu.memory_space<vmem>>, vector<1x8x8xbf16>
    %43 = vector.shape_cast %42 : vector<1x8x8xbf16> to vector<8x8xbf16>
    %44 = vector.shape_cast %41 : vector<8x8xbf16> to vector<1x8x8xbf16>
    tpu.vector_store %arg16[%c0_18, %c0_19, %c0_20], %44 {strides = array<i32>} : memref<8x8x8xbf16, #tpu.memory_space<vmem>>, vector<1x8x8xbf16>,
    %45 = vector.extract_strided_slice %34 {offsets = [0, 0], sizes = [8, 8], strides = [1, 1]} : vector<16x32xf32> to vector<8x8xf32>
    %46 = arith.truncf %45 : vector<8x8xf32> to vector<8x8xbf16>
    %c0_21 = arith.constant 0 : index
    %c0_22 = arith.constant 0 : index
    %c0_23 = arith.constant 0 : index
    %47 = vector.load %arg17[%c0_21, %c0_22, %c0_23] : memref<8x8x8xbf16, #tpu.memory_space<vmem>>, vector<1x8x8xbf16>
    %48 = vector.shape_cast %47 : vector<1x8x8xbf16> to vector<8x8xbf16>
    %49 = vector.shape_cast %46 : vector<8x8xbf16> to vector<1x8x8xbf16>
    tpu.vector_store %arg17[%c0_21, %c0_22, %c0_23], %49 {strides = array<i32>} : memref<8x8x8xbf16, #tpu.memory_space<vmem>>, vector<1x8x8xbf16>,
    %50 = vector.extract_strided_slice %32 {offsets = [0, 8], sizes = [8, 8], strides = [1, 1]} : vector<16x32xf32> to vector<8x8xf32>
    %51 = arith.truncf %50 : vector<8x8xf32> to vector<8x8xbf16>
    %c1 = arith.constant 1 : index
    %c0_24 = arith.constant 0 : index
    %c0_25 = arith.constant 0 : index
    %52 = vector.load %arg15[%c1, %c0_24, %c0_25] : memref<8x8x8xbf16, #tpu.memory_space<vmem>>, vector<1x8x8xbf16>
    %53 = vector.shape_cast %52 : vector<1x8x8xbf16> to vector<8x8xbf16>
    %54 = vector.shape_cast %51 : vector<8x8xbf16> to vector<1x8x8xbf16>
    tpu.vector_store %arg15[%c1, %c0_24, %c0_25], %54 {strides = array<i32>} : memref<8x8x8xbf16, #tpu.memory_space<vmem>>, vector<1x8x8xbf16>,
    %55 = vector.extract_strided_slice %33 {offsets = [0, 8], sizes = [8, 8], strides = [1, 1]} : vector<16x32xf32> to vector<8x8xf32>
    %56 = arith.truncf %55 : vector<8x8xf32> to vector<8x8xbf16>
    %c1_26 = arith.constant 1 : index
    %c0_27 = arith.constant 0 : index
    %c0_28 = arith.constant 0 : index
    %57 = vector.load %arg16[%c1_26, %c0_27, %c0_28] : memref<8x8x8xbf16, #tpu.memory_space<vmem>>, vector<1x8x8xbf16>
    %58 = vector.shape_cast %57 : vector<1x8x8xbf16> to vector<8x8xbf16>
    %59 = vector.shape_cast %56 : vector<8x8xbf16> to vector<1x8x8xbf16>
    tpu.vector_store %arg16[%c1_26, %c0_27, %c0_28], %59 {strides = array<i32>} : memref<8x8x8xbf16, #tpu.memory_space<vmem>>, vector<1x8x8xbf16>,
    %60 = vector.extract_strided_slice %34 {offsets = [0, 8], sizes = [8, 8], strides = [1, 1]} : vector<16x32xf32> to vector<8x8xf32>
    %61 = arith.truncf %60 : vector<8x8xf32> to vector<8x8xbf16>
    %c1_29 = arith.constant 1 : index
    %c0_30 = arith.constant 0 : index
    %c0_31 = arith.constant 0 : index
    %62 = vector.load %arg17[%c1_29, %c0_30, %c0_31] : memref<8x8x8xbf16, #tpu.memory_space<vmem>>, vector<1x8x8xbf16>
    %63 = vector.shape_cast %62 : vector<1x8x8xbf16> to vector<8x8xbf16>
    %64 = vector.shape_cast %61 : vector<8x8xbf16> to vector<1x8x8xbf16>
    tpu.vector_store %arg17[%c1_29, %c0_30, %c0_31], %64 {strides = array<i32>} : memref<8x8x8xbf16, #tpu.memory_space<vmem>>, vector<1x8x8xbf16>,
    %65 = vector.extract_strided_slice %32 {offsets = [0, 16], sizes = [8, 8], strides = [1, 1]} : vector<16x32xf32> to vector<8x8xf32>
    %66 = arith.truncf %65 : vector<8x8xf32> to vector<8x8xbf16>
    %c2 = arith.constant 2 : index
    %c0_32 = arith.constant 0 : index
    %c0_33 = arith.constant 0 : index
    %67 = vector.load %arg15[%c2, %c0_32, %c0_33] : memref<8x8x8xbf16, #tpu.memory_space<vmem>>, vector<1x8x8xbf16>
    %68 = vector.shape_cast %67 : vector<1x8x8xbf16> to vector<8x8xbf16>
    %69 = vector.shape_cast %66 : vector<8x8xbf16> to vector<1x8x8xbf16>
    tpu.vector_store %arg15[%c2, %c0_32, %c0_33], %69 {strides = array<i32>} : memref<8x8x8xbf16, #tpu.memory_space<vmem>>, vector<1x8x8xbf16>,
    %70 = vector.extract_strided_slice %33 {offsets = [0, 16], sizes = [8, 8], strides = [1, 1]} : vector<16x32xf32> to vector<8x8xf32>
    %71 = arith.truncf %70 : vector<8x8xf32> to vector<8x8xbf16>
    %c2_34 = arith.constant 2 : index
    %c0_35 = arith.constant 0 : index
    %c0_36 = arith.constant 0 : index
    %72 = vector.load %arg16[%c2_34, %c0_35, %c0_36] : memref<8x8x8xbf16, #tpu.memory_space<vmem>>, vector<1x8x8xbf16>
    %73 = vector.shape_cast %72 : vector<1x8x8xbf16> to vector<8x8xbf16>
    %74 = vector.shape_cast %71 : vector<8x8xbf16> to vector<1x8x8xbf16>
    tpu.vector_store %arg16[%c2_34, %c0_35, %c0_36], %74 {strides = array<i32>} : memref<8x8x8xbf16, #tpu.memory_space<vmem>>, vector<1x8x8xbf16>,
    %75 = vector.extract_strided_slice %34 {offsets = [0, 16], sizes = [8, 8], strides = [1, 1]} : vector<16x32xf32> to vector<8x8xf32>
    %76 = arith.truncf %75 : vector<8x8xf32> to vector<8x8xbf16>
    %c2_37 = arith.constant 2 : index
    %c0_38 = arith.constant 0 : index
    %c0_39 = arith.constant 0 : index
    %77 = vector.load %arg17[%c2_37, %c0_38, %c0_39] : memref<8x8x8xbf16, #tpu.memory_space<vmem>>, vector<1x8x8xbf16>
    %78 = vector.shape_cast %77 : vector<1x8x8xbf16> to vector<8x8xbf16>
    %79 = vector.shape_cast %76 : vector<8x8xbf16> to vector<1x8x8xbf16>
    tpu.vector_store %arg17[%c2_37, %c0_38, %c0_39], %79 {strides = array<i32>} : memref<8x8x8xbf16, #tpu.memory_space<vmem>>, vector<1x8x8xbf16>,
    %80 = vector.extract_strided_slice %32 {offsets = [0, 24], sizes = [8, 8], strides = [1, 1]} : vector<16x32xf32> to vector<8x8xf32>
    %81 = arith.truncf %80 : vector<8x8xf32> to vector<8x8xbf16>
    %c3 = arith.constant 3 : index
    %c0_40 = arith.constant 0 : index
    %c0_41 = arith.constant 0 : index
    %82 = vector.load %arg15[%c3, %c0_40, %c0_41] : memref<8x8x8xbf16, #tpu.memory_space<vmem>>, vector<1x8x8xbf16>
    %83 = vector.shape_cast %82 : vector<1x8x8xbf16> to vector<8x8xbf16>
    %84 = vector.shape_cast %81 : vector<8x8xbf16> to vector<1x8x8xbf16>
    tpu.vector_store %arg15[%c3, %c0_40, %c0_41], %84 {strides = array<i32>} : memref<8x8x8xbf16, #tpu.memory_space<vmem>>, vector<1x8x8xbf16>,
    %85 = vector.extract_strided_slice %33 {offsets = [0, 24], sizes = [8, 8], strides = [1, 1]} : vector<16x32xf32> to vector<8x8xf32>
    %86 = arith.truncf %85 : vector<8x8xf32> to vector<8x8xbf16>
    %c3_42 = arith.constant 3 : index
    %c0_43 = arith.constant 0 : index
    %c0_44 = arith.constant 0 : index
    %87 = vector.load %arg16[%c3_42, %c0_43, %c0_44] : memref<8x8x8xbf16, #tpu.memory_space<vmem>>, vector<1x8x8xbf16>
    %88 = vector.shape_cast %87 : vector<1x8x8xbf16> to vector<8x8xbf16>
    %89 = vector.shape_cast %86 : vector<8x8xbf16> to vector<1x8x8xbf16>
    tpu.vector_store %arg16[%c3_42, %c0_43, %c0_44], %89 {strides = array<i32>} : memref<8x8x8xbf16, #tpu.memory_space<vmem>>, vector<1x8x8xbf16>,
    %90 = vector.extract_strided_slice %34 {offsets = [0, 24], sizes = [8, 8], strides = [1, 1]} : vector<16x32xf32> to vector<8x8xf32>
    %91 = arith.truncf %90 : vector<8x8xf32> to vector<8x8xbf16>
    %c3_45 = arith.constant 3 : index
    %c0_46 = arith.constant 0 : index
    %c0_47 = arith.constant 0 : index
    %92 = vector.load %arg17[%c3_45, %c0_46, %c0_47] : memref<8x8x8xbf16, #tpu.memory_space<vmem>>, vector<1x8x8xbf16>
    %93 = vector.shape_cast %92 : vector<1x8x8xbf16> to vector<8x8xbf16>
    %94 = vector.shape_cast %91 : vector<8x8xbf16> to vector<1x8x8xbf16>
    tpu.vector_store %arg17[%c3_45, %c0_46, %c0_47], %94 {strides = array<i32>} : memref<8x8x8xbf16, #tpu.memory_space<vmem>>, vector<1x8x8xbf16>,
    %95 = vector.extract_strided_slice %32 {offsets = [8, 0], sizes = [8, 8], strides = [1, 1]} : vector<16x32xf32> to vector<8x8xf32>
    %96 = arith.truncf %95 : vector<8x8xf32> to vector<8x8xbf16>
    %c4 = arith.constant 4 : index
    %c0_48 = arith.constant 0 : index
    %c0_49 = arith.constant 0 : index
    %97 = vector.load %arg15[%c4, %c0_48, %c0_49] : memref<8x8x8xbf16, #tpu.memory_space<vmem>>, vector<1x8x8xbf16>
    %98 = vector.shape_cast %97 : vector<1x8x8xbf16> to vector<8x8xbf16>
    %99 = vector.shape_cast %96 : vector<8x8xbf16> to vector<1x8x8xbf16>
    tpu.vector_store %arg15[%c4, %c0_48, %c0_49], %99 {strides = array<i32>} : memref<8x8x8xbf16, #tpu.memory_space<vmem>>, vector<1x8x8xbf16>,
    %100 = vector.extract_strided_slice %33 {offsets = [8, 0], sizes = [8, 8], strides = [1, 1]} : vector<16x32xf32> to vector<8x8xf32>
    %101 = arith.truncf %100 : vector<8x8xf32> to vector<8x8xbf16>
    %c4_50 = arith.constant 4 : index
    %c0_51 = arith.constant 0 : index
    %c0_52 = arith.constant 0 : index
    %102 = vector.load %arg16[%c4_50, %c0_51, %c0_52] : memref<8x8x8xbf16, #tpu.memory_space<vmem>>, vector<1x8x8xbf16>
    %103 = vector.shape_cast %102 : vector<1x8x8xbf16> to vector<8x8xbf16>
    %104 = vector.shape_cast %101 : vector<8x8xbf16> to vector<1x8x8xbf16>
    tpu.vector_store %arg16[%c4_50, %c0_51, %c0_52], %104 {strides = array<i32>} : memref<8x8x8xbf16, #tpu.memory_space<vmem>>, vector<1x8x8xbf16>,
    %105 = vector.extract_strided_slice %34 {offsets = [8, 0], sizes = [8, 8], strides = [1, 1]} : vector<16x32xf32> to vector<8x8xf32>
    %106 = arith.truncf %105 : vector<8x8xf32> to vector<8x8xbf16>
    %c4_53 = arith.constant 4 : index
    %c0_54 = arith.constant 0 : index
    %c0_55 = arith.constant 0 : index
    %107 = vector.load %arg17[%c4_53, %c0_54, %c0_55] : memref<8x8x8xbf16, #tpu.memory_space<vmem>>, vector<1x8x8xbf16>
    %108 = vector.shape_cast %107 : vector<1x8x8xbf16> to vector<8x8xbf16>
    %109 = vector.shape_cast %106 : vector<8x8xbf16> to vector<1x8x8xbf16>
    tpu.vector_store %arg17[%c4_53, %c0_54, %c0_55], %109 {strides = array<i32>} : memref<8x8x8xbf16, #tpu.memory_space<vmem>>, vector<1x8x8xbf16>,
    %110 = vector.extract_strided_slice %32 {offsets = [8, 8], sizes = [8, 8], strides = [1, 1]} : vector<16x32xf32> to vector<8x8xf32>
    %111 = arith.truncf %110 : vector<8x8xf32> to vector<8x8xbf16>
    %c5 = arith.constant 5 : index
    %c0_56 = arith.constant 0 : index
    %c0_57 = arith.constant 0 : index
    %112 = vector.load %arg15[%c5, %c0_56, %c0_57] : memref<8x8x8xbf16, #tpu.memory_space<vmem>>, vector<1x8x8xbf16>
    %113 = vector.shape_cast %112 : vector<1x8x8xbf16> to vector<8x8xbf16>
    %114 = vector.shape_cast %111 : vector<8x8xbf16> to vector<1x8x8xbf16>
    tpu.vector_store %arg15[%c5, %c0_56, %c0_57], %114 {strides = array<i32>} : memref<8x8x8xbf16, #tpu.memory_space<vmem>>, vector<1x8x8xbf16>,
    %115 = vector.extract_strided_slice %33 {offsets = [8, 8], sizes = [8, 8], strides = [1, 1]} : vector<16x32xf32> to vector<8x8xf32>
    %116 = arith.truncf %115 : vector<8x8xf32> to vector<8x8xbf16>
    %c5_58 = arith.constant 5 : index
    %c0_59 = arith.constant 0 : index
    %c0_60 = arith.constant 0 : index
    %117 = vector.load %arg16[%c5_58, %c0_59, %c0_60] : memref<8x8x8xbf16, #tpu.memory_space<vmem>>, vector<1x8x8xbf16>
    %118 = vector.shape_cast %117 : vector<1x8x8xbf16> to vector<8x8xbf16>
    %119 = vector.shape_cast %116 : vector<8x8xbf16> to vector<1x8x8xbf16>
    tpu.vector_store %arg16[%c5_58, %c0_59, %c0_60], %119 {strides = array<i32>} : memref<8x8x8xbf16, #tpu.memory_space<vmem>>, vector<1x8x8xbf16>,
    %120 = vector.extract_strided_slice %34 {offsets = [8, 8], sizes = [8, 8], strides = [1, 1]} : vector<16x32xf32> to vector<8x8xf32>
    %121 = arith.truncf %120 : vector<8x8xf32> to vector<8x8xbf16>
    %c5_61 = arith.constant 5 : index
    %c0_62 = arith.constant 0 : index
    %c0_63 = arith.constant 0 : index
    %122 = vector.load %arg17[%c5_61, %c0_62, %c0_63] : memref<8x8x8xbf16, #tpu.memory_space<vmem>>, vector<1x8x8xbf16>
    %123 = vector.shape_cast %122 : vector<1x8x8xbf16> to vector<8x8xbf16>
    %124 = vector.shape_cast %121 : vector<8x8xbf16> to vector<1x8x8xbf16>
    tpu.vector_store %arg17[%c5_61, %c0_62, %c0_63], %124 {strides = array<i32>} : memref<8x8x8xbf16, #tpu.memory_space<vmem>>, vector<1x8x8xbf16>,
    %125 = vector.extract_strided_slice %32 {offsets = [8, 16], sizes = [8, 8], strides = [1, 1]} : vector<16x32xf32> to vector<8x8xf32>
    %126 = arith.truncf %125 : vector<8x8xf32> to vector<8x8xbf16>
    %c6 = arith.constant 6 : index
    %c0_64 = arith.constant 0 : index
    %c0_65 = arith.constant 0 : index
    %127 = vector.load %arg15[%c6, %c0_64, %c0_65] : memref<8x8x8xbf16, #tpu.memory_space<vmem>>, vector<1x8x8xbf16>
    %128 = vector.shape_cast %127 : vector<1x8x8xbf16> to vector<8x8xbf16>
    %129 = vector.shape_cast %126 : vector<8x8xbf16> to vector<1x8x8xbf16>
    tpu.vector_store %arg15[%c6, %c0_64, %c0_65], %129 {strides = array<i32>} : memref<8x8x8xbf16, #tpu.memory_space<vmem>>, vector<1x8x8xbf16>,
    %130 = vector.extract_strided_slice %33 {offsets = [8, 16], sizes = [8, 8], strides = [1, 1]} : vector<16x32xf32> to vector<8x8xf32>
    %131 = arith.truncf %130 : vector<8x8xf32> to vector<8x8xbf16>
    %c6_66 = arith.constant 6 : index
    %c0_67 = arith.constant 0 : index
    %c0_68 = arith.constant 0 : index
    %132 = vector.load %arg16[%c6_66, %c0_67, %c0_68] : memref<8x8x8xbf16, #tpu.memory_space<vmem>>, vector<1x8x8xbf16>
    %133 = vector.shape_cast %132 : vector<1x8x8xbf16> to vector<8x8xbf16>
    %134 = vector.shape_cast %131 : vector<8x8xbf16> to vector<1x8x8xbf16>
    tpu.vector_store %arg16[%c6_66, %c0_67, %c0_68], %134 {strides = array<i32>} : memref<8x8x8xbf16, #tpu.memory_space<vmem>>, vector<1x8x8xbf16>,
    %135 = vector.extract_strided_slice %34 {offsets = [8, 16], sizes = [8, 8], strides = [1, 1]} : vector<16x32xf32> to vector<8x8xf32>
    %136 = arith.truncf %135 : vector<8x8xf32> to vector<8x8xbf16>
    %c6_69 = arith.constant 6 : index
    %c0_70 = arith.constant 0 : index
    %c0_71 = arith.constant 0 : index
    %137 = vector.load %arg17[%c6_69, %c0_70, %c0_71] : memref<8x8x8xbf16, #tpu.memory_space<vmem>>, vector<1x8x8xbf16>
    %138 = vector.shape_cast %137 : vector<1x8x8xbf16> to vector<8x8xbf16>
    %139 = vector.shape_cast %136 : vector<8x8xbf16> to vector<1x8x8xbf16>
    tpu.vector_store %arg17[%c6_69, %c0_70, %c0_71], %139 {strides = array<i32>} : memref<8x8x8xbf16, #tpu.memory_space<vmem>>, vector<1x8x8xbf16>,
    %140 = vector.extract_strided_slice %32 {offsets = [8, 24], sizes = [8, 8], strides = [1, 1]} : vector<16x32xf32> to vector<8x8xf32>
    %141 = arith.truncf %140 : vector<8x8xf32> to vector<8x8xbf16>
    %c7 = arith.constant 7 : index
    %c0_72 = arith.constant 0 : index
    %c0_73 = arith.constant 0 : index
    %142 = vector.load %arg15[%c7, %c0_72, %c0_73] : memref<8x8x8xbf16, #tpu.memory_space<vmem>>, vector<1x8x8xbf16>
    %143 = vector.shape_cast %142 : vector<1x8x8xbf16> to vector<8x8xbf16>
    %144 = vector.shape_cast %141 : vector<8x8xbf16> to vector<1x8x8xbf16>
    tpu.vector_store %arg15[%c7, %c0_72, %c0_73], %144 {strides = array<i32>} : memref<8x8x8xbf16, #tpu.memory_space<vmem>>, vector<1x8x8xbf16>,
    %145 = vector.extract_strided_slice %33 {offsets = [8, 24], sizes = [8, 8], strides = [1, 1]} : vector<16x32xf32> to vector<8x8xf32>
    %146 = arith.truncf %145 : vector<8x8xf32> to vector<8x8xbf16>
    %c7_74 = arith.constant 7 : index
    %c0_75 = arith.constant 0 : index
    %c0_76 = arith.constant 0 : index
    %147 = vector.load %arg16[%c7_74, %c0_75, %c0_76] : memref<8x8x8xbf16, #tpu.memory_space<vmem>>, vector<1x8x8xbf16>
    %148 = vector.shape_cast %147 : vector<1x8x8xbf16> to vector<8x8xbf16>
    %149 = vector.shape_cast %146 : vector<8x8xbf16> to vector<1x8x8xbf16>
    tpu.vector_store %arg16[%c7_74, %c0_75, %c0_76], %149 {strides = array<i32>} : memref<8x8x8xbf16, #tpu.memory_space<vmem>>, vector<1x8x8xbf16>,
    %150 = vector.extract_strided_slice %34 {offsets = [8, 24], sizes = [8, 8], strides = [1, 1]} : vector<16x32xf32> to vector<8x8xf32>
    %151 = arith.truncf %150 : vector<8x8xf32> to vector<8x8xbf16>
    %c7_77 = arith.constant 7 : index
    %c0_78 = arith.constant 0 : index
    %c0_79 = arith.constant 0 : index
    %152 = vector.load %arg17[%c7_77, %c0_78, %c0_79] : memref<8x8x8xbf16, #tpu.memory_space<vmem>>, vector<1x8x8xbf16>
    %153 = vector.shape_cast %152 : vector<1x8x8xbf16> to vector<8x8xbf16>
    %154 = vector.shape_cast %151 : vector<8x8xbf16> to vector<1x8x8xbf16>
    tpu.vector_store %arg17[%c7_77, %c0_78, %c0_79], %154 {strides = array<i32>} : memref<8x8x8xbf16, #tpu.memory_space<vmem>>, vector<1x8x8xbf16>,
    %c0_80 = arith.constant 0 : index
    %c0_81 = arith.constant 0 : index
    %c0_82 = arith.constant 0 : index
    %155 = vector.load %arg15[%c0_80, %c0_81, %c0_82] : memref<8x8x8xbf16, #tpu.memory_space<vmem>>, vector<8x8x8xbf16>
    %c0_83 = arith.constant 0 : index
    %c0_84 = arith.constant 0 : index
    %c0_85 = arith.constant 0 : index
    %156 = vector.load %arg16[%c0_83, %c0_84, %c0_85] : memref<8x8x8xbf16, #tpu.memory_space<vmem>>, vector<8x8x8xbf16>
    "tpu.trace_start"() <{level = 10 : i32, message = "gqd,gkd->gqk"}> : () -> ()
    %cst_86 = arith.constant dense<0.000000e+00> : vector<8x8x8xf32>
    %157 = tpu.matmul %155, %156, %cst_86 {dimension_numbers = #tpu.dot_dimension_numbers<[2], [2], [1], [1], [0, 0, 0, 1, 1, 1], [0], [0]>} : vector<8x8x8xbf16>, vector<8x8x8xbf16>, vector<8x8x8xf32> -> vector<8x8x8xf32>
    "tpu.trace_stop"() : () -> ()
    %cst_87 = arith.constant dense<0xFF800000> : vector<8x8xf32>
    %158 = vector.multi_reduction <maximumf>, %157, %cst_87 [2] : vector<8x8x8xf32> to vector<8x8xf32>
    %159 = vector.shape_cast %158 : vector<8x8xf32> to vector<8x8x1xf32>
    %160 = vector.broadcast %159 : vector<8x8x1xf32> to vector<8x8x8xf32>
    %161 = arith.subf %157, %160 : vector<8x8x8xf32>
    %162 = math.exp %161 : vector<8x8x8xf32>
    %cst_88 = arith.constant dense<0.000000e+00> : vector<8x8xf32>
    %163 = vector.multi_reduction <add>, %162, %cst_88 [2] : vector<8x8x8xf32> to vector<8x8xf32>
    %164 = vector.shape_cast %163 : vector<8x8xf32> to vector<8x8x1xf32>
    %165 = arith.truncf %162 : vector<8x8x8xf32> to vector<8x8x8xbf16>
    %c0_89 = arith.constant 0 : index
    %c0_90 = arith.constant 0 : index
    %c0_91 = arith.constant 0 : index
    %166 = vector.load %arg17[%c0_89, %c0_90, %c0_91] : memref<8x8x8xbf16, #tpu.memory_space<vmem>>, vector<8x8x8xbf16>
    "tpu.trace_start"() <{level = 10 : i32, message = "gqk,gkd->gqd"}> : () -> ()
    %cst_92 = arith.constant dense<0.000000e+00> : vector<8x8x8xf32>
    %167 = tpu.matmul %165, %166, %cst_92 {dimension_numbers = #tpu.dot_dimension_numbers<[2], [1], [1], [2], [0, 0, 0, 1, 1, 2], [0], [0]>} : vector<8x8x8xbf16>, vector<8x8x8xbf16>, vector<8x8x8xf32> -> vector<8x8x8xf32>
    "tpu.trace_stop"() : () -> ()
    %168 = tpu.reciprocal %164 {approx = true} : vector<8x8x1xf32> -> vector<8x8x1xf32>
    %169 = vector.broadcast %168 : vector<8x8x1xf32> to vector<8x8x8xf32>
    %170 = arith.mulf %167, %169 : vector<8x8x8xf32>
    %171 = vector.extract_strided_slice %170 {offsets = [0, 0, 0], sizes = [1, 8, 8], strides = [1, 1, 1]} : vector<8x8x8xf32> to vector<1x8x8xf32>
    %172 = vector.shape_cast %171 : vector<1x8x8xf32> to vector<8x8xf32>
    %173 = arith.truncf %172 : vector<8x8xf32> to vector<8x8xbf16>
    %c0_93 = arith.constant 0 : index
    %c0_94 = arith.constant 0 : index
    %174 = vector.load %arg18[%c0_93, %c0_94] : memref<16x32xbf16, #tpu.memory_space<vmem>>, vector<8x8xbf16>
    tpu.vector_store %arg18[%c0_93, %c0_94], %173 {strides = array<i32>} : memref<16x32xbf16, #tpu.memory_space<vmem>>, vector<8x8xbf16>,
    %175 = vector.extract_strided_slice %170 {offsets = [1, 0, 0], sizes = [1, 8, 8], strides = [1, 1, 1]} : vector<8x8x8xf32> to vector<1x8x8xf32>
    %176 = vector.shape_cast %175 : vector<1x8x8xf32> to vector<8x8xf32>
    %177 = arith.truncf %176 : vector<8x8xf32> to vector<8x8xbf16>
    %c0_95 = arith.constant 0 : index
    %c8 = arith.constant 8 : index
    %178 = vector.load %arg18[%c0_95, %c8] : memref<16x32xbf16, #tpu.memory_space<vmem>>, vector<8x8xbf16>
    tpu.vector_store %arg18[%c0_95, %c8], %177 {strides = array<i32>} : memref<16x32xbf16, #tpu.memory_space<vmem>>, vector<8x8xbf16>,
    %179 = vector.extract_strided_slice %170 {offsets = [2, 0, 0], sizes = [1, 8, 8], strides = [1, 1, 1]} : vector<8x8x8xf32> to vector<1x8x8xf32>
    %180 = vector.shape_cast %179 : vector<1x8x8xf32> to vector<8x8xf32>
    %181 = arith.truncf %180 : vector<8x8xf32> to vector<8x8xbf16>
    %c0_96 = arith.constant 0 : index
    %c16 = arith.constant 16 : index
    %182 = vector.load %arg18[%c0_96, %c16] : memref<16x32xbf16, #tpu.memory_space<vmem>>, vector<8x8xbf16>
    tpu.vector_store %arg18[%c0_96, %c16], %181 {strides = array<i32>} : memref<16x32xbf16, #tpu.memory_space<vmem>>, vector<8x8xbf16>,
    %183 = vector.extract_strided_slice %170 {offsets = [3, 0, 0], sizes = [1, 8, 8], strides = [1, 1, 1]} : vector<8x8x8xf32> to vector<1x8x8xf32>
    %184 = vector.shape_cast %183 : vector<1x8x8xf32> to vector<8x8xf32>
    %185 = arith.truncf %184 : vector<8x8xf32> to vector<8x8xbf16>
    %c0_97 = arith.constant 0 : index
    %c24 = arith.constant 24 : index
    %186 = vector.load %arg18[%c0_97, %c24] : memref<16x32xbf16, #tpu.memory_space<vmem>>, vector<8x8xbf16>
    tpu.vector_store %arg18[%c0_97, %c24], %185 {strides = array<i32>} : memref<16x32xbf16, #tpu.memory_space<vmem>>, vector<8x8xbf16>,
    %187 = vector.extract_strided_slice %170 {offsets = [4, 0, 0], sizes = [1, 8, 8], strides = [1, 1, 1]} : vector<8x8x8xf32> to vector<1x8x8xf32>
    %188 = vector.shape_cast %187 : vector<1x8x8xf32> to vector<8x8xf32>
    %189 = arith.truncf %188 : vector<8x8xf32> to vector<8x8xbf16>
    %c8_98 = arith.constant 8 : index
    %c0_99 = arith.constant 0 : index
    %190 = vector.load %arg18[%c8_98, %c0_99] : memref<16x32xbf16, #tpu.memory_space<vmem>>, vector<8x8xbf16>
    tpu.vector_store %arg18[%c8_98, %c0_99], %189 {strides = array<i32>} : memref<16x32xbf16, #tpu.memory_space<vmem>>, vector<8x8xbf16>,
    %191 = vector.extract_strided_slice %170 {offsets = [5, 0, 0], sizes = [1, 8, 8], strides = [1, 1, 1]} : vector<8x8x8xf32> to vector<1x8x8xf32>
    %192 = vector.shape_cast %191 : vector<1x8x8xf32> to vector<8x8xf32>
    %193 = arith.truncf %192 : vector<8x8xf32> to vector<8x8xbf16>
    %c8_100 = arith.constant 8 : index
    %c8_101 = arith.constant 8 : index
    %194 = vector.load %arg18[%c8_100, %c8_101] : memref<16x32xbf16, #tpu.memory_space<vmem>>, vector<8x8xbf16>
    tpu.vector_store %arg18[%c8_100, %c8_101], %193 {strides = array<i32>} : memref<16x32xbf16, #tpu.memory_space<vmem>>, vector<8x8xbf16>,
    %195 = vector.extract_strided_slice %170 {offsets = [6, 0, 0], sizes = [1, 8, 8], strides = [1, 1, 1]} : vector<8x8x8xf32> to vector<1x8x8xf32>
    %196 = vector.shape_cast %195 : vector<1x8x8xf32> to vector<8x8xf32>
    %197 = arith.truncf %196 : vector<8x8xf32> to vector<8x8xbf16>
    %c8_102 = arith.constant 8 : index
    %c16_103 = arith.constant 16 : index
    %198 = vector.load %arg18[%c8_102, %c16_103] : memref<16x32xbf16, #tpu.memory_space<vmem>>, vector<8x8xbf16>
    tpu.vector_store %arg18[%c8_102, %c16_103], %197 {strides = array<i32>} : memref<16x32xbf16, #tpu.memory_space<vmem>>, vector<8x8xbf16>,
    %199 = vector.extract_strided_slice %170 {offsets = [7, 0, 0], sizes = [1, 8, 8], strides = [1, 1, 1]} : vector<8x8x8xf32> to vector<1x8x8xf32>
    %200 = vector.shape_cast %199 : vector<1x8x8xf32> to vector<8x8xf32>
    %201 = arith.truncf %200 : vector<8x8xf32> to vector<8x8xbf16>
    %c8_104 = arith.constant 8 : index
    %c24_105 = arith.constant 24 : index
    %202 = vector.load %arg18[%c8_104, %c24_105] : memref<16x32xbf16, #tpu.memory_space<vmem>>, vector<8x8xbf16>
    tpu.vector_store %arg18[%c8_104, %c24_105], %201 {strides = array<i32>} : memref<16x32xbf16, #tpu.memory_space<vmem>>, vector<8x8xbf16>,
    %c0_106 = arith.constant 0 : index
    %c0_107 = arith.constant 0 : index
    %203 = vector.load %arg18[%c0_106, %c0_107] : memref<16x32xbf16, #tpu.memory_space<vmem>>, vector<16x32xbf16>
    %c0_108 = arith.constant 0 : index
    %c0_109 = arith.constant 0 : index
    %204 = vector.load %arg6[%c0_108, %c0_109] : memref<32x32xbf16, #tpu.memory_space<vmem>>, vector<32x32xbf16>
    %cst_110 = arith.constant dense<0.000000e+00> : vector<16x32xf32>
    %205 = tpu.matmul %203, %204, %cst_110 {dimension_numbers = #tpu.dot_dimension_numbers<[1], [0], [0], [1], [0, 0, 1, 1], [], []>} : vector<16x32xbf16>, vector<32x32xbf16>, vector<16x32xf32> -> vector<16x32xf32>
    %c0_111 = arith.constant 0 : index
    %c0_112 = arith.constant 0 : index
    %206 = vector.load %arg7[%c0_111, %c0_112] : memref<1x32xf32, #tpu.memory_space<vmem>>, vector<1x32xf32>
    %207 = vector.broadcast %206 : vector<1x32xf32> to vector<16x32xf32>
    %208 = arith.addf %205, %207 : vector<16x32xf32>
    %209 = arith.addf %1, %208 : vector<16x32xf32>
    %c0_113 = arith.constant 0 : index
    %c0_114 = arith.constant 0 : index
    %210 = vector.load %arg8[%c0_113, %c0_114] : memref<1x32xf32, #tpu.memory_space<vmem>>, vector<1x32xf32>
    %c0_115 = arith.constant 0 : index
    %c0_116 = arith.constant 0 : index
    %211 = vector.load %arg9[%c0_115, %c0_116] : memref<1x32xf32, #tpu.memory_space<vmem>>, vector<1x32xf32>
    %cst_117 = arith.constant dense<0.000000e+00> : vector<16xf32>
    %212 = vector.multi_reduction <add>, %209, %cst_117 [1] : vector<16x32xf32> to vector<16xf32>
    %213 = vector.shape_cast %212 : vector<16xf32> to vector<16x1xf32>
    %cst_118 = arith.constant 3.200000e+01 : f32
    %214 = vector.broadcast %cst_118 : f32 to vector<16x1xf32>
    %215 = arith.divf %213, %214 : vector<16x1xf32>
    %216 = vector.broadcast %215 : vector<16x1xf32> to vector<16x32xf32>
    %217 = arith.subf %209, %216 : vector<16x32xf32>
    %218 = arith.mulf %217, %217 : vector<16x32xf32>
    %cst_119 = arith.constant dense<0.000000e+00> : vector<16xf32>
    %219 = vector.multi_reduction <add>, %218, %cst_119 [1] : vector<16x32xf32> to vector<16xf32>
    %220 = vector.shape_cast %219 : vector<16xf32> to vector<16x1xf32>
    %cst_120 = arith.constant 3.200000e+01 : f32
    %221 = vector.broadcast %cst_120 : f32 to vector<16x1xf32>
    %222 = arith.divf %220, %221 : vector<16x1xf32>
    %223 = vector.broadcast %215 : vector<16x1xf32> to vector<16x32xf32>
    %224 = arith.subf %209, %223 : vector<16x32xf32>
    %cst_121 = arith.constant 9.99999974E-6 : f32
    %225 = vector.broadcast %cst_121 : f32 to vector<16x1xf32>
    %226 = arith.addf %222, %225 : vector<16x1xf32>
    %227 = math.rsqrt %226 : vector<16x1xf32>
    %228 = vector.broadcast %227 : vector<16x1xf32> to vector<16x32xf32>
    %229 = arith.mulf %224, %228 : vector<16x32xf32>
    %230 = vector.broadcast %210 : vector<1x32xf32> to vector<16x32xf32>
    %231 = arith.mulf %229, %230 : vector<16x32xf32>
    %232 = vector.broadcast %211 : vector<1x32xf32> to vector<16x32xf32>
    %233 = arith.addf %231, %232 : vector<16x32xf32>
    %234 = arith.truncf %233 : vector<16x32xf32> to vector<16x32xbf16>
    %c0_122 = arith.constant 0 : index
    %c0_123 = arith.constant 0 : index
    %235 = vector.load %arg10[%c0_122, %c0_123] : memref<32x128xbf16, #tpu.memory_space<vmem>>, vector<32x128xbf16>
    %cst_124 = arith.constant dense<0.000000e+00> : vector<16x128xf32>
    %236 = tpu.matmul %234, %235, %cst_124 {dimension_numbers = #tpu.dot_dimension_numbers<[1], [0], [0], [1], [0, 0, 1, 1], [], []>} : vector<16x32xbf16>, vector<32x128xbf16>, vector<16x128xf32> -> vector<16x128xf32>
    %c0_125 = arith.constant 0 : index
    %c0_126 = arith.constant 0 : index
    %237 = vector.load %arg11[%c0_125, %c0_126] : memref<1x128xf32, #tpu.memory_space<vmem>>, vector<1x128xf32>
    %238 = vector.broadcast %237 : vector<1x128xf32> to vector<16x128xf32>
    %239 = arith.addf %236, %238 : vector<16x128xf32>
    %cst_127 = arith.constant 1.702000e+00 : f32
    %240 = vector.broadcast %cst_127 : f32 to vector<16x128xf32>
    %241 = arith.mulf %240, %239 : vector<16x128xf32>
    %242 = arith.negf %241 : vector<16x128xf32>
    %243 = math.exp %242 : vector<16x128xf32>
    %cst_128 = arith.constant 1.000000e+00 : f32
    %244 = vector.broadcast %cst_128 : f32 to vector<16x128xf32>
    %245 = arith.addf %244, %243 : vector<16x128xf32>
    %246 = arith.divf %244, %245 : vector<16x128xf32>
    %247 = arith.mulf %239, %246 : vector<16x128xf32>
    %248 = arith.truncf %247 : vector<16x128xf32> to vector<16x128xbf16>
    %c0_129 = arith.constant 0 : index
    %c0_130 = arith.constant 0 : index
    %249 = vector.load %arg12[%c0_129, %c0_130] : memref<128x32xbf16, #tpu.memory_space<vmem>>, vector<128x32xbf16>
    %cst_131 = arith.constant dense<0.000000e+00> : vector<16x32xf32>
    %250 = tpu.matmul %248, %249, %cst_131 {dimension_numbers = #tpu.dot_dimension_numbers<[1], [0], [0], [1], [0, 0, 1, 1], [], []>} : vector<16x128xbf16>, vector<128x32xbf16>, vector<16x32xf32> -> vector<16x32xf32>
    %c0_132 = arith.constant 0 : index
    %c0_133 = arith.constant 0 : index
    %251 = vector.load %arg13[%c0_132, %c0_133] : memref<1x32xf32, #tpu.memory_space<vmem>>, vector<1x32xf32>
    %252 = vector.broadcast %251 : vector<1x32xf32> to vector<16x32xf32>
    %253 = arith.addf %250, %252 : vector<16x32xf32>
    %254 = arith.addf %209, %253 : vector<16x32xf32>
    %255 = vector.shape_cast %254 : vector<16x32xf32> to vector<2x8x32xf32>
    %c0_134 = arith.constant 0 : index
    %c0_135 = arith.constant 0 : index
    %c0_136 = arith.constant 0 : index
    %256 = vector.load %arg14[%c0_134, %c0_135, %c0_136] : memref<2x8x32xf32, #tpu.memory_space<vmem>>, vector<2x8x32xf32>
    tpu.vector_store %arg14[%c0_134, %c0_135, %c0_136], %255 {strides = array<i32>} : memref<2x8x32xf32, #tpu.memory_space<vmem>>, vector<2x8x32xf32>,
    return
  }
  func.func @transform_0(%arg0: i32) -> (i32, i32, i32) {
    %c0_i32 = arith.constant 0 : i32
    %c0_i32_0 = arith.constant 0 : i32
    %c0_i32_1 = arith.constant 0 : i32
    return %arg0, %c0_i32, %c0_i32_0 : i32, i32, i32
  }
  func.func @transform_1(%arg0: i32) -> (i32, i32) {
    %c0_i32 = arith.constant 0 : i32
    %c0_i32_0 = arith.constant 0 : i32
    %c0_i32_1 = arith.constant 0 : i32
    return %c0_i32, %c0_i32_0 : i32, i32
  }
  func.func @transform_2(%arg0: i32) -> (i32, i32) {
    %c0_i32 = arith.constant 0 : i32
    %c0_i32_0 = arith.constant 0 : i32
    %c0_i32_1 = arith.constant 0 : i32
    return %c0_i32, %c0_i32_0 : i32, i32
  }
  func.func @transform_3(%arg0: i32) -> (i32, i32) {
    %c0_i32 = arith.constant 0 : i32
    %c0_i32_0 = arith.constant 0 : i32
    %c0_i32_1 = arith.constant 0 : i32
    return %c0_i32, %c0_i32_0 : i32, i32
  }
  func.func @transform_4(%arg0: i32) -> (i32, i32) {
    %c0_i32 = arith.constant 0 : i32
    %c0_i32_0 = arith.constant 0 : i32
    %c0_i32_1 = arith.constant 0 : i32
    return %c0_i32, %c0_i32_0 : i32, i32
  }
  func.func @transform_5(%arg0: i32) -> (i32, i32) {
    %c0_i32 = arith.constant 0 : i32
    %c0_i32_0 = arith.constant 0 : i32
    %c0_i32_1 = arith.constant 0 : i32
    return %c0_i32, %c0_i32_0 : i32, i32
  }
  func.func @transform_6(%arg0: i32) -> (i32, i32) {
    %c0_i32 = arith.constant 0 : i32
    %c0_i32_0 = arith.constant 0 : i32
    %c0_i32_1 = arith.constant 0 : i32
    return %c0_i32, %c0_i32_0 : i32, i32
  }
  func.func @transform_7(%arg0: i32) -> (i32, i32) {
    %c0_i32 = arith.constant 0 : i32
    %c0_i32_0 = arith.constant 0 : i32
    %c0_i32_1 = arith.constant 0 : i32
    return %c0_i32, %c0_i32_0 : i32, i32
  }
  func.func @transform_8(%arg0: i32) -> (i32, i32) {
    %c0_i32 = arith.constant 0 : i32
    %c0_i32_0 = arith.constant 0 : i32
    %c0_i32_1 = arith.constant 0 : i32
    return %c0_i32, %c0_i32_0 : i32, i32
  }
  func.func @transform_9(%arg0: i32) -> (i32, i32) {
    %c0_i32 = arith.constant 0 : i32
    %c0_i32_0 = arith.constant 0 : i32
    %c0_i32_1 = arith.constant 0 : i32
    return %c0_i32, %c0_i32_0 : i32, i32
  }
  func.func @transform_10(%arg0: i32) -> (i32, i32) {
    %c0_i32 = arith.constant 0 : i32
    %c0_i32_0 = arith.constant 0 : i32
    %c0_i32_1 = arith.constant 0 : i32
    return %c0_i32, %c0_i32_0 : i32, i32
  }
  func.func @transform_11(%arg0: i32) -> (i32, i32) {
    %c0_i32 = arith.constant 0 : i32
    %c0_i32_0 = arith.constant 0 : i32
    %c0_i32_1 = arith.constant 0 : i32
    return %c0_i32, %c0_i32_0 : i32, i32
  }
  func.func @transform_12(%arg0: i32) -> (i32, i32) {
    %c0_i32 = arith.constant 0 : i32
    %c0_i32_0 = arith.constant 0 : i32
    %c0_i32_1 = arith.constant 0 : i32
    return %c0_i32, %c0_i32_0 : i32, i32
  }
  func.func @transform_13(%arg0: i32) -> (i32, i32, i32) {
    %c0_i32 = arith.constant 0 : i32
    %c0_i32_0 = arith.constant 0 : i32
    %c0_i32_1 = arith.constant 0 : i32
    return %arg0, %c0_i32, %c0_i32_0 : i32, i32, i32
  }
}

</mosaic_0001>

<bundles_post_ra>
// kernel: tpu_custom_call.1
= control target key start
LH: loop header
LB: loop body
LE: loop exit
PB: predicated region body
PF: predicated region fallthrough
CT: control target
= control target key end

     0   :  { %7 = vsyncpa [#allocation3], 0  ;;  %s170_s0 = inlined_call_operand.hbm [shape: f32[8,128], index: 0, kind: input, shape index: {}]   ;;  %s171_s1 = inlined_call_operand.hbm [shape: f32[8,128], index: 1, kind: input, shape index: {}]   ;;  %s172_s2 = inlined_call_operand.hbm [shape: f32[8,128], index: 2, kind: output, shape index: {}]  }
   0x1   :  { %8 = vsyncpa [#allocation6], 0 }
   0x2   :  { %9 = vsyncpa [#allocation4], 0  ;;  %s15_s11 = sshll.u32 %s170_s0, 4  ;;  %s143_s12 = smov [#allocation2]   ;;  %s16_s11 = int_to_ptr.hbm [resolvable:$true] %s15_s11 }
   0x3   :  { %s17_s13 = sshll.u32 %s143_s12, 4  ;;  %s26_s16 = sshll.u32 %s171_s1, 4  ;;  %s18_s13 = int_to_ptr.vmem [resolvable:$true] %s17_s13  ;;  %s27_s16 = int_to_ptr.hbm [resolvable:$true] %s26_s16 }
   0x4   :  { %20 = dma.hbm_to_vmem [thread:$0]  %s16_s11, 128, %s18_s13, [#allocation3]  }
   0x5   :  { %s144_s17 = smov [#allocation5]  }
   0x6   :  { %s28_s18 = sshll.u32 %s144_s17, 4  ;;  %s29_s18 = int_to_ptr.vmem [resolvable:$true] %s28_s18 }
   0x7   :  { %31 = dma.hbm_to_vmem [thread:$0]  %s27_s16, 128, %s29_s18, [#allocation6]  }
   0x8   :  { %137 = dma.done.wait [#allocation3], 128  }
   0x9   :  { %138 = vsyncadd [#allocation3], 4294967168 }
   0xa   :  { %139 = dma.done.wait [#allocation6], 128  }
   0xb   :  { %140 = vsyncadd [#allocation6], 4294967168  ;;  %s145_s19 = smov [#allocation7]   ;;  %s51_s22 = sshll.u32 %s172_s2, 4  ;;  %v40_v0 = vld [vmem:[#allocation2] sm:$0xff]  ;;  %v41_v1 = vld [vmem:[#allocation5] sm:$0xff]  ;;  %s52_s22 = int_to_ptr.hbm [resolvable:$true] %s51_s22 }
   0xc   :  { %s49_s0 = sshll.u32 %s145_s19, 4  ;;  %v42_v2 = vadd.f32 %v41_v1, %v40_v0  ;;  %s50_s0 = int_to_ptr.vmem [resolvable:$true] %s49_s0 }
   0xe   :  { %43 = vst [vmem:[#allocation7] sm:$0xff] %v42_v2 }
   0xf   :  { %54 = dma.vmem_to_hbm [thread:$0]  %s50_s0, 128, %s52_s22, [#allocation4]  }
  0x10   :  { %141 = dma.done.wait [#allocation4], 128  }
  0x11   :  { %142 = vsyncadd [#allocation4], 4294967168 }
  0x12   :  { %59 = vsyncpa [#allocation3], 1 }
  0x13   :  { %60 = vsyncpa [#allocation6], 1 }
  0x14   :  { %61 = vsyncpa [#allocation4], 1 }

// kernel: tpu_custom_call.1
= control target key start
LH: loop header
LB: loop body
LE: loop exit
PB: predicated region body
PF: predicated region fallthrough
CT: control target
= control target key end

     0   :  { %vm50_vm0 = vcmask 261120   ;;  %s1551_s0 = inlined_call_operand.vmem [shape: f32[2,8,32], index: 0, kind: input, shape index: {}]   ;;  %s1552_s1 = inlined_call_operand.vmem [shape: f32[1,32], index: 1, kind: input, shape index: {}]   ;;  %s1553_s2 = inlined_call_operand.vmem [shape: f32[1,32], index: 2, kind: input, shape index: {}]   ;;  %s1554_s3 = inlined_call_operand.vmem [shape: bf16[32,96], index: 3, kind: input, shape index: {}]   ;;  %s1555_s4 = inlined_call_operand.vmem [shape: f32[1,96], index: 4, kind: input, shape index: {}]   ;;  %s1556_s5 = inlined_call_operand.vmem [shape: bf16[32,32], index: 5, kind: input, shape index: {}]   ;;  %s1557_s6 = inlined_call_operand.vmem [shape: f32[1,32], index: 6, kind: input, shape index: {}]   ;;  %s1558_s7 = inlined_call_operand.vmem [shape: f32[1,32], index: 7, kind: input, shape index: {}]   ;;  %s1559_s8 = inlined_call_operand.vmem [shape: f32[1,32], index: 8, kind: input, shape index: {}]   ;;  %s1560_s9 = inlined_call_operand.vmem [shape: bf16[32,128], index: 9, kind: input, shape index: {}]   ;;  %s1561_s10 = inlined_call_operand.vmem [shape: f32[1,128], index: 10, kind: input, shape index: {}]   ;;  %s1562_s11 = inlined_call_operand.vmem [shape: bf16[128,32], index: 11, kind: input, shape index: {}]   ;;  %s1563_s12 = inlined_call_operand.vmem [shape: f32[1,32], index: 12, kind: input, shape index: {}]   ;;  %s1564_s13 = inlined_call_operand.hbm [shape: f32[2,8,32], index: 13, kind: output, shape index: {}]  }
   0x1   :  { %v1309_v0 = vld [vmem:[%s1551_s0] sm:$0xff] }
   0x2   :  { %v51_v1 = vsel %vm50_vm0, %v1309_v0, 0.0 }
   0x3   :  { %52 = vadd.xlane.f32.xlu0 %v51_v1 }
   0x4   :  { %18 = vsyncpa [#allocation7], 0  ;;  %v1316_v2 = vld [vmem:[%s1551_s0 + $0x8] sm:$0xff]  ;;  %v1219_v4 = vmov 32.0   ;;  %v1103_v23 = vld [vmem:[%s1554_s3] sm:$0xff]  ;;  %vm151_vm8 = vcmask 60416  }
   0x5   :  { %v54_v3 = vsel %vm50_vm0, %v1316_v2, 0.0  ;;  %1143 = vrcp.f32 %v1219_v4  ;;  %v1104_v21 = vld [vmem:[%s1554_s3 + $0x8] sm:$0xff]  ;;  %v1135_v42 = vld [vmem:[%s1552_s1] ss:$0 sm:$0xff]  ;;  %s1220_s1 = smov 112   ;;  %s1221_s20 = smov 120  }
   0x6   :  { %142 = vmatpush.bf16.msra.mxu0 %v1104_v21  ;;  %v1136_v47 = vld [vmem:[%s1553_s2] ss:$0 sm:$0xff]  ;;  %s1222_s2 = smov 88   ;;  %s1224_s21 = smov 80   ;;  %vm282_vm9 = vcmask 64512   ;;  %vm526_vm10 = vcmask 1043456  }
   0x7   :  { %v1137_v52 = vld [vmem:[%s1555_s4] ss:$0 sm:$0xff]  ;;  %s1223_s4 = smov 104   ;;  %s1225_s22 = smov 96   ;;  %vm699_vm11 = vcmask 126016   ;;  %vm706_vm12 = vcmask 191616  }
   0x8   :  { %s1226_s23 = smov 72   ;;  %s1227_s24 = smov 56   ;;  %vm713_vm13 = vcmask 257216  }
   0x9   :  { %s1228_s25 = smov 48   ;;  %s1229_s26 = smov 40  }
   0xa   :  { %143 = vmatpush.bf16.msra.mxu0 %v1103_v23  ;;  %s1230_s27 = smov 64   ;;  %s1231_s28 = smov 16  }
   0xb   :  { %55 = vadd.xlane.f32.xlu0 %v54_v3  ;;  %v1144_v5 = vpop.eup %1143  ;;  %s1232_s0 = smov 8   ;;  %s1233_s29 = smov 24  }
   0xc   :  { %v58_v6 = vmul.f32 32.0, %v1144_v5  ;;  %vm62_vm1 = vweird.f32 %v1144_v5 }
   0xe   :  { %v59_v7 = vsub.f32 1.0, %v58_v6 }
  0x10   :  { %v60_v8 = vmul.f32 %v1144_v5, %v59_v7 }
  0x12   :  { %v61_v9 = vadd.f32 %v1144_v5, %v60_v8 }
  0x14   :  { %v1320_v10 = vsel %vm62_vm1, %v1144_v5, %v61_v9 }
  0x76   :  { %v53_v11 = vpop.xlane.xlu0 %52 }
  0x77   :  { %v64_v12 = vmul.f32 %v1320_v10, %v53_v11 }
  0x79   :  { %v66_v13 = vsub.f32 %v1309_v0, %v64_v12 }
  0x7b   :  { %v68_v14 = vmul.f32 %v66_v13, %v66_v13 }
  0x7d   :  { %v70_v15 = vsel %vm50_vm0, %v68_v14, 0.0 }
  0x7e   :  { %71 = vadd.xlane.f32.xlu1 %v70_v15  ;;  %v56_v16 = vpop.xlane.xlu0 %55 }
  0x7f   :  { %v65_v17 = vmul.f32 %v1320_v10, %v56_v16 }
  0x81   :  { %v67_v18 = vsub.f32 %v1316_v2, %v65_v17 }
  0x83   :  { %v69_v19 = vmul.f32 %v67_v18, %v67_v18 }
  0x85   :  { %v73_v20 = vsel %vm50_vm0, %v69_v19, 0.0 }
  0x86   :  { %74 = vadd.xlane.f32.xlu1 %v73_v20 }
  0xf1   :  { %v72_v22 = vpop.xlane.xlu1 %71 }
  0xf2   :  { %v76_v24 = vmul.f32 %v72_v22, %v1320_v10 }
  0xf4   :  { %v78_v25 = vadd.f32 1e-05, %v76_v24 }
  0xf6   :  { %1145 = vrsqrt.f32 %v78_v25  ;;  %vm86_vm3 = vweird.f32 %v78_v25 }
  0xf9   :  { %v75_v26 = vpop.xlane.xlu1 %74 }
  0xfa   :  { %v77_v27 = vmul.f32 %v75_v26, %v1320_v10 }
  0xfc   :  { %v1146_v28 = vpop.eup %1145  ;;  %v79_v29 = vadd.f32 1e-05, %v77_v27 }
  0xfd   :  { %v81_v30 = vmul.f32 %v1146_v28, %v78_v25  ;;  %vm87_vm2 = vweird.f32 %v1146_v28 }
  0xfe   :  { %1147 = vrsqrt.f32 %v79_v29  ;;  %vm88_vm4 = vmor %vm86_vm3, %vm87_vm2  ;;  %vm96_vm6 = vweird.f32 %v79_v29 }
  0xff   :  { %v82_v31 = vmul.f32 %v1146_v28, %v81_v30 }
 0x101   :  { %v83_v32 = vmul.f32 0.5, %v82_v31 }
 0x103   :  { %v84_v33 = vsub.f32 1.5, %v83_v32 }
 0x104   :  { %v1148_v34 = vpop.eup %1147 }
 0x105   :  { %v85_v35 = vmul.f32 %v1146_v28, %v84_v33  ;;  %v91_v36 = vmul.f32 %v1148_v34, %v79_v29  ;;  %vm97_vm5 = vweird.f32 %v1148_v34 }
 0x106   :  { %vm98_vm7 = vmor %vm96_vm6, %vm97_vm5 }
 0x107   :  { %v92_v37 = vmul.f32 %v1148_v34, %v91_v36  ;;  %v89_v38 = vsel %vm88_vm4, %v1146_v28, %v85_v35 }
 0x108   :  { %v100_v41 = vmul.f32 %v89_v38, %v66_v13 }
 0x109   :  { %v93_v39 = vmul.f32 0.5, %v92_v37 }
 0x10a   :  { %v105_v46 = vmul.f32 %v1135_v42, %v100_v41 }
 0x10b   :  { %v94_v40 = vsub.f32 1.5, %v93_v39 }
 0x10c   :  { %v110_v49 = vadd.f32 %v1136_v47, %v105_v46 }
 0x10d   :  { %v95_v43 = vmul.f32 %v1148_v34, %v94_v40 }
 0x10f   :  { %v99_v44 = vsel %vm98_vm7, %v1148_v34, %v95_v43 }
 0x110   :  { %v101_v45 = vmul.f32 %v99_v44, %v67_v18 }
 0x112   :  { %v106_v48 = vmul.f32 %v1135_v42, %v101_v45 }
 0x114   :  { %v111_v50 = vadd.f32 %v1136_v47, %v106_v48 }
 0x116   :  { %v112_v51 = vpack.c.bf16 %v111_v50, %v110_v49 }
 0x118   :  { %1030 = vmatmul.msk.bf16.vlgmr.msra.gmra.mxu0 %vm50_vm0, %v112_v51 }
 0x195   :  { %v145_v53 = vpop.f32.mrf.mxu0 }
 0x196   :  { %v146_v54 = vadd.f32 %v1137_v52, %v145_v53 }
 0x198   :  { %v1346_v55 = vpack.c.bf16 %v146_v54, %v146_v54 }
 0x19a   :  { %177 = vrot.lane.b32.xlu1 %v1346_v55, %s1220_s1  ;;  %162 = vrot.lane.b32.xlu0 %v1346_v55, %s1221_s20  ;;  %152 = vst.msk [vmem:[#allocation2] sm:$0xf] %vm151_vm8, %v1346_v55 }
 0x19b   :  { %167 = vrot.lane.b32.xlu2 %v1346_v55, %s1222_s2 }
 0x19d   :  { %v147_v56 = vpop.f32.mrf.mxu0 }
 0x19e   :  { %v148_v57 = vadd.f32 %v1137_v52, %v147_v56 }
 0x1a0   :  { %v1353_v58 = vpack.c.bf16 %v148_v57, %v148_v57 }
 0x1a1   :  { %v266_v32 = vld [vmem:[#allocation2] sm:$0xf] }
 0x1a2   :  { %236 = vrot.lane.b32.xlu1 %v1353_v58, %s1220_s1  ;;  %192 = vrot.lane.b32.xlu0 %v1346_v55, %s1223_s4  ;;  %209 = vst.msk [vmem:[#allocation2 + $0x10] sm:$0xf] %vm151_vm8, %v1353_v58 }
 0x1a3   :  { %182 = vrot.lane.b32.xlu2 %v1346_v55, %s1224_s21 }
 0x1a9   :  { %v270_v39 = vld [vmem:[#allocation2 + $0x10] sm:$0xf] }
 0x1aa   :  { %154 = vrot.lane.b32.xlu1 %v1346_v55, %s1225_s22  ;;  %256 = vrot.lane.b32.xlu0 %v1353_v58, %s1226_s23 }
 0x1ab   :  { %197 = vrot.lane.b32.xlu2 %v1346_v55, %s1226_s23 }
 0x1b2   :  { %211 = vrot.lane.b32.xlu0 %v1353_v58, %s1225_s22 }
 0x1b3   :  { %226 = vrot.lane.b32.xlu2 %v1353_v58, %s1222_s2 }
 0x1ba   :  { %172 = vrot.lane.b32.xlu0 %v1346_v55, %s1227_s24 }
 0x1bb   :  { %241 = vrot.lane.b32.xlu2 %v1353_v58, %s1224_s21 }
 0x1c2   :  { %187 = vrot.lane.b32.xlu0 %v1346_v55, %s1228_s25 }
 0x1c3   :  { %221 = vrot.lane.b32.xlu2 %v1353_v58, %s1221_s20 }
 0x1cb   :  { %251 = vrot.lane.b32.xlu2 %v1353_v58, %s1223_s4 }
 0x1f5   :  { %v168_v59 = vpop.permute.xlu2 %167 }
 0x1f6   :  { %171 = vst.msk [vmem:[#allocation3 + $0x4] sm:$0xf] %vm151_vm8, %v168_v59 }
 0x1fd   :  { %v183_v60 = vpop.permute.xlu2 %182  ;;  %v275_v61 = vld [vmem:[#allocation3 + $0x4] sm:$0xf] }
 0x1fe   :  { %186 = vst.msk [vmem:[#allocation3 + $0x8] sm:$0xf] %vm151_vm8, %v183_v60  ;;  %v306_v62 = vsel %vm282_vm9, %v275_v61, 0 }
 0x1ff   :  { %315 = vmatpush.bf16.xpose.msra.mxu2 %v306_v62 }
 0x205   :  { %v198_v63 = vpop.permute.xlu2 %197  ;;  %v276_v1 = vld [vmem:[#allocation3 + $0x8] sm:$0xf] }
 0x206   :  { %201 = vst.msk [vmem:[#allocation3 + $0xc] sm:$0xf] %vm151_vm8, %v198_v63  ;;  %v325_v3 = vsel %vm282_vm9, %v276_v1, 0 }
 0x207   :  { %334 = vmatpush.bf16.xpose.msra.mxu3 %v325_v3 }
 0x20c   :  { %v178_v4 = vpop.permute.xlu1 %177  ;;  %v163_v5 = vpop.permute.xlu0 %162 }
 0x20d   :  { %181 = vst.msk [vmem:[#allocation2 + $0x8] sm:$0xf] %vm151_vm8, %v178_v4  ;;  %v227_v6 = vpop.permute.xlu2 %226  ;;  %v277_v7 = vld [vmem:[#allocation3 + $0xc] sm:$0xf] }
 0x20e   :  { %166 = vst.msk [vmem:[#allocation2 + $0x4] sm:$0xf] %vm151_vm8, %v163_v5  ;;  %v344_v8 = vsel %vm282_vm9, %v277_v7, 0 }
 0x20f   :  { %230 = vst.msk [vmem:[#allocation3 + $0x14] sm:$0xf] %vm151_vm8, %v227_v6  ;;  %353 = vmatpush.bf16.xpose.msrb.mxu0 %v344_v8 }
 0x214   :  { %v237_v9 = vpop.permute.xlu1 %236  ;;  %v193_v11 = vpop.permute.xlu0 %192  ;;  %v268_v12 = vld [vmem:[#allocation2 + $0x8] sm:$0xf] }
 0x215   :  { %240 = vst.msk [vmem:[#allocation2 + $0x18] sm:$0xf] %vm151_vm8, %v237_v9  ;;  %v242_v13 = vpop.permute.xlu2 %241  ;;  %v267_v14 = vld [vmem:[#allocation2 + $0x4] sm:$0xf]  ;;  %1033 = vmatmul.msk.bf16.vlgmr.msra.gmra.mxu3 %vm282_vm9, %v268_v12 }
 0x216   :  { %196 = vst.msk [vmem:[#allocation2 + $0xc] sm:$0xf] %vm151_vm8, %v193_v11  ;;  %1032 = vmatmul.msk.bf16.vlgmr.msra.gmra.mxu2 %vm282_vm9, %v267_v14  ;;  %v279_v15 = vld [vmem:[#allocation3 + $0x14] sm:$0xf] }
 0x217   :  { %245 = vst.msk [vmem:[#allocation3 + $0x18] sm:$0xf] %vm151_vm8, %v242_v13  ;;  %v382_v16 = vsel %vm282_vm9, %v279_v15, 0 }
 0x218   :  { %391 = vmatpush.bf16.xpose.msrb.mxu2 %v382_v16 }
 0x21c   :  { %v155_v17 = vpop.permute.xlu1 %154  ;;  %v257_v18 = vpop.permute.xlu0 %256  ;;  %v272_v24 = vld [vmem:[#allocation2 + $0x18] sm:$0xf] }
 0x21d   :  { %157 = vst.msk [vmem:[#allocation3] sm:$0xf] %vm151_vm8, %v155_v17  ;;  %v222_v19 = vpop.permute.xlu2 %221  ;;  %v269_v20 = vld [vmem:[#allocation2 + $0xc] sm:$0xf] }
 0x21e   :  { %260 = vst.msk [vmem:[#allocation3 + $0x1c] sm:$0xf] %vm151_vm8, %v257_v18  ;;  %1034 = vmatmul.msk.bf16.vlgmr.msrb.gmra.mxu0 %vm282_vm9, %v269_v20  ;;  %v280_v21 = vld [vmem:[#allocation3 + $0x18] sm:$0xf] }
 0x21f   :  { %225 = vst.msk [vmem:[#allocation2 + $0x14] sm:$0xf] %vm151_vm8, %v222_v19  ;;  %v401_v22 = vsel %vm282_vm9, %v280_v21, 0 }
 0x220   :  { %410 = vmatpush.bf16.xpose.msrb.mxu3 %v401_v22 }
 0x224   :  { %v212_v23 = vpop.permute.xlu0 %211  ;;  %v274_v25 = vld [vmem:[#allocation3] sm:$0xf] }
 0x225   :  { %215 = vst.msk [vmem:[#allocation3 + $0x10] sm:$0xf] %vm151_vm8, %v212_v23  ;;  %v252_v26 = vpop.permute.xlu2 %251  ;;  %v287_v27 = vsel %vm282_vm9, %v274_v25, 0  ;;  %v281_v28 = vld [vmem:[#allocation3 + $0x1c] sm:$0xf] }
 0x226   :  { %255 = vst.msk [vmem:[#allocation2 + $0x1c] sm:$0xf] %vm151_vm8, %v252_v26  ;;  %v271_v29 = vld [vmem:[#allocation2 + $0x14] sm:$0xf]  ;;  %296 = vmatpush.bf16.xpose.msra.mxu1 %v287_v27  ;;  %v420_v30 = vsel %vm282_vm9, %v281_v28, 0 }
 0x227   :  { %1036 = vmatmul.msk.bf16.vlgmr.msrb.gmra.mxu2 %vm282_vm9, %v271_v29  ;;  %1037 = vmatmul.msk.bf16.vlgmr.msrb.gmra.mxu3 %vm282_vm9, %v272_v24 }
 0x228   :  { %429 = vmatpush.bf16.xpose.msra.mxu0 %v420_v30 }
 0x22c   :  { %v173_v31 = vpop.permute.xlu0 %172  ;;  %v278_v33 = vld [vmem:[#allocation3 + $0x10] sm:$0xf] }
 0x22d   :  { %176 = vst.msk [vmem:[#allocation4 + $0x4] sm:$0xf] %vm151_vm8, %v173_v31  ;;  %1031 = vmatmul.msk.bf16.vlgmr.msra.gmra.mxu1 %vm282_vm9, %v266_v32  ;;  %v273_v34 = vld [vmem:[#allocation2 + $0x1c] sm:$0xf]  ;;  %v363_v35 = vsel %vm282_vm9, %v278_v33, 0 }
 0x22e   :  { %372 = vmatpush.bf16.xpose.msrb.mxu1 %v363_v35 }
 0x22f   :  { %1038 = vmatmul.msk.bf16.vlgmr.msra.gmra.mxu0 %vm282_vm9, %v273_v34 }
 0x234   :  { %v188_v36 = vpop.permute.xlu0 %187  ;;  %v516_v37 = vld [vmem:[#allocation4 + $0x4] sm:$0xf] }
 0x235   :  { %191 = vst.msk [vmem:[#allocation4 + $0x8] sm:$0xf] %vm151_vm8, %v188_v36  ;;  %v547_v38 = vsel %vm526_vm10, %v516_v37, 0 }
 0x236   :  { %556 = vmatpush.bf16.msra.mxu2 %v547_v38 }
 0x23c   :  { %v517_v40 = vld [vmem:[#allocation4 + $0x8] sm:$0xf] }
 0x23d   :  { %1035 = vmatmul.msk.bf16.vlgmr.msrb.gmra.mxu1 %vm282_vm9, %v270_v39  ;;  %v566_v41 = vsel %vm526_vm10, %v517_v40, 0 }
 0x23e   :  { %575 = vmatpush.bf16.msra.mxu3 %v566_v41 }
 0x298   :  { %v336_v42 = vpop.f32.mrf.mxu3 }
 0x299   :  { %v317_v43 = vpop.f32.mrf.mxu2  ;;  %v441_v44 = vsel %vm282_vm9, %v336_v42, -inf }
 0x29a   :  { %v438_v45 = vsel %vm282_vm9, %v317_v43, -inf  ;;  %442 = vmax.xlane.f32.xlu1 %v441_v44 }
 0x29b   :  { %439 = vmax.xlane.f32.xlu2 %v438_v45  ;;  %v355_v46 = vpop.f32.mrf.mxu0 }
 0x29c   :  { %v444_v47 = vsel %vm282_vm9, %v355_v46, -inf }
 0x29d   :  { %445 = vmax.xlane.f32.xlu0 %v444_v47 }
 0x2a0   :  { %v338_v48 = vpop.f32.mrf.mxu3 }
 0x2a1   :  { %v319_v49 = vpop.f32.mrf.mxu2 }
 0x2a3   :  { %v357_v50 = vpop.f32.mrf.mxu0 }
 0x2aa   :  { %v393_v51 = vpop.f32.mrf.mxu2  ;;  %v1409_v52 = vpop.f32.mrf.mxu3 }
 0x2ab   :  { %v450_v53 = vsel %vm282_vm9, %v393_v51, -inf  ;;  %v1412_v54 = vpop.f32.mrf.mxu1  ;;  %v453_v60 = vsel %vm282_vm9, %v1409_v52, -inf }
 0x2ac   :  { %451 = vmax.xlane.f32.xlu1 %v450_v53  ;;  %v1414_v56 = vpop.f32.mrf.mxu0  ;;  %v435_v5 = vsel %vm282_vm9, %v1412_v54, -inf }
 0x2ad   :  { %v456_v3 = vsel %vm282_vm9, %v1414_v56, -inf }
 0x2b1   :  { %246 = vrot.lane.b32.xlu0 %v1353_v58, %s1228_s25 }
 0x2b2   :  { %v395_v57 = vpop.f32.mrf.mxu2  ;;  %v414_v59 = vpop.f32.mrf.mxu3 }
 0x2b3   :  { %202 = vrot.lane.b32.xlu2 %v1346_v55, %s1229_s26  ;;  %v300_v61 = vpop.f32.mrf.mxu1 }
 0x2b4   :  { %454 = vmax.xlane.f32.xlu1 %v453_v60  ;;  %v433_v62 = vpop.f32.mrf.mxu0 }
 0x2b9   :  { %261 = vrot.lane.b32.xlu0 %v1353_v58, %s1229_s26 }
 0x2bb   :  { %v1422_v63 = vpop.f32.mrf.mxu1 }
 0x2bc   :  { %v447_v4 = vsel %vm282_vm9, %v1422_v63, -inf }
 0x2c1   :  { %158 = vrot.lane.b32.xlu0 %v1346_v55, %s1230_s27 }
 0x2c3   :  { %v376_v1 = vpop.f32.mrf.mxu1 }
 0x2cd   :  { %231 = vrot.lane.b32.xlu1 %v1353_v58, %s1227_s24 }
 0x2dc   :  { %457 = vmax.xlane.f32.xlu2 %v456_v3 }
 0x2eb   :  { %448 = vmax.xlane.f32.xlu0 %v447_v4 }
 0x2f4   :  { %216 = vrot.lane.b32.xlu2 %v1353_v58, %s1230_s27 }
 0x2f7   :  { %436 = vmax.xlane.f32.xlu1 %v435_v5 }
 0x30d   :  { %v443_v6 = vpop.xlane.xlu1 %442 }
 0x30e   :  { %v461_v55 = vsub.f32 %v336_v42, %v443_v6  ;;  %v440_v7 = vpop.xlane.xlu2 %439 }
 0x30f   :  { %v460_v8 = vsub.f32 %v317_v43, %v440_v7 }
 0x310   :  { %v471_v9 = vmul.f32 1.442695, %v461_v55  ;;  %v446_v11 = vpop.xlane.xlu0 %445 }
 0x311   :  { %v469_v12 = vmul.f32 1.442695, %v460_v8  ;;  %v462_v13 = vsub.f32 %v355_v46, %v446_v11 }
 0x312   :  { %1149 = vpow2.f32 %v471_v9 }
 0x313   :  { %1151 = vpow2.f32 %v469_v12  ;;  %v473_v14 = vmul.f32 1.442695, %v462_v13 }
 0x315   :  { %1153 = vpow2.f32 %v473_v14 }
 0x316   :  { %v203_v15 = vpop.permute.xlu2 %202 }
 0x317   :  { %206 = vst.msk [vmem:[#allocation4 + $0xc] sm:$0xf] %vm151_vm8, %v203_v15 }
 0x318   :  { %v1150_v16 = vpop.eup %1149 }
 0x319   :  { %v1152_v58 = vpop.eup %1151  ;;  %v509_v17 = vpack.c.bf16 %v1150_v16, %v1150_v16  ;;  %v489_v27 = vsel %vm282_vm9, %v1150_v16, 0.0 }
 0x31a   :  { %v508_v18 = vpack.c.bf16 %v1152_v58, %v1152_v58  ;;  %v486_v19 = vsel %vm282_vm9, %v1152_v58, 0.0 }
 0x31b   :  { %487 = vadd.xlane.f32.xlu1 %v486_v19  ;;  %1041 = vmatmul.msk.bf16.vlgmr.msra.gmra.mxu3 %vm282_vm9, %v509_v17  ;;  %v1154_v20 = vpop.eup %1153 }
 0x31c   :  { %1040 = vmatmul.msk.bf16.vlgmr.msra.gmra.mxu2 %vm282_vm9, %v508_v18  ;;  %v510_v25 = vpack.c.bf16 %v1154_v20, %v1154_v20  ;;  %v492_v33 = vsel %vm282_vm9, %v1154_v20, 0.0 }
 0x31e   :  { %v518_v21 = vld [vmem:[#allocation4 + $0xc] sm:$0xf] }
 0x31f   :  { %v452_v22 = vpop.xlane.xlu1 %451  ;;  %v585_v23 = vsel %vm526_vm10, %v518_v21, 0 }
 0x320   :  { %v464_v24 = vsub.f32 %v393_v51, %v452_v22  ;;  %594 = vmatpush.bf16.msrb.mxu0 %v585_v23 }
 0x322   :  { %v477_v26 = vmul.f32 1.442695, %v464_v24 }
 0x323   :  { %v247_v28 = vpop.permute.xlu0 %246  ;;  %1042 = vmatmul.msk.bf16.vlgmr.msrb.gmra.mxu0 %vm282_vm9, %v510_v25  ;;  %490 = vadd.xlane.f32.xlu1 %v489_v27 }
 0x324   :  { %1155 = vpow2.f32 %v477_v26  ;;  %250 = vst.msk [vmem:[#allocation4 + $0x18] sm:$0xf] %vm151_vm8, %v247_v28 }
 0x327   :  { %v455_v29 = vpop.xlane.xlu1 %454 }
 0x328   :  { %v465_v30 = vsub.f32 %v1409_v52, %v455_v29 }
 0x32a   :  { %v1156_v31 = vpop.eup %1155  ;;  %v479_v32 = vmul.f32 1.442695, %v465_v30 }
 0x32b   :  { %v262_v34 = vpop.permute.xlu0 %261  ;;  %v498_v35 = vsel %vm282_vm9, %v1156_v31, 0.0  ;;  %493 = vadd.xlane.f32.xlu1 %v492_v33  ;;  %v521_v36 = vld [vmem:[#allocation4 + $0x18] sm:$0xf]  ;;  %v512_v48 = vpack.c.bf16 %v1156_v31, %v1156_v31 }
 0x32c   :  { %1157 = vpow2.f32 %v479_v32  ;;  %265 = vst.msk [vmem:[#allocation4 + $0x1c] sm:$0xf] %vm151_vm8, %v262_v34  ;;  %499 = vadd.xlane.f32.xlu2 %v498_v35  ;;  %v642_v37 = vsel %vm526_vm10, %v521_v36, 0 }
 0x32d   :  { %651 = vmatpush.bf16.msrb.mxu3 %v642_v37 }
 0x332   :  { %v1158_v38 = vpop.eup %1157 }
 0x333   :  { %v513_v39 = vpack.c.bf16 %v1158_v38, %v1158_v38  ;;  %v159_v40 = vpop.permute.xlu0 %158  ;;  %v522_v41 = vld [vmem:[#allocation4 + $0x1c] sm:$0xf] }
 0x334   :  { %161 = vst.msk [vmem:[#allocation4] sm:$0xf] %vm151_vm8, %v159_v40  ;;  %v661_v42 = vsel %vm526_vm10, %v522_v41, 0 }
 0x335   :  { %1045 = vmatmul.msk.bf16.vlgmr.msrb.gmra.mxu3 %vm282_vm9, %v513_v39  ;;  %670 = vmatpush.bf16.msra.mxu0 %v661_v42 }
 0x33b   :  { %v515_v43 = vld [vmem:[#allocation4] sm:$0xf] }
 0x33c   :  { %v528_v44 = vsel %vm526_vm10, %v515_v43, 0 }
 0x33d   :  { %537 = vmatpush.bf16.msra.mxu1 %v528_v44 }
 0x33f   :  { %v232_v45 = vpop.permute.xlu1 %231 }
 0x340   :  { %235 = vst.msk [vmem:[#allocation4 + $0x14] sm:$0xf] %vm151_vm8, %v232_v45 }
 0x347   :  { %v520_v46 = vld [vmem:[#allocation4 + $0x14] sm:$0xf] }
 0x348   :  { %v623_v47 = vsel %vm526_vm10, %v520_v46, 0 }
 0x349   :  { %632 = vmatpush.bf16.msrb.mxu2 %v623_v47 }
 0x34c   :  { %1044 = vmatmul.msk.bf16.vlgmr.msrb.gmra.mxu2 %vm282_vm9, %v512_v48 }
 0x34f   :  { %v458_v49 = vpop.xlane.xlu2 %457 }
 0x350   :  { %v466_v50 = vsub.f32 %v1414_v56, %v458_v49  ;;  %v501_v56 = vsel %vm282_vm9, %v1158_v38, 0.0 }
 0x352   :  { %v481_v51 = vmul.f32 1.442695, %v466_v50 }
 0x354   :  { %1159 = vpow2.f32 %v481_v51 }
 0x357   :  { %v217_v52 = vpop.permute.xlu2 %216 }
 0x358   :  { %220 = vst.msk [vmem:[#allocation4 + $0x10] sm:$0xf] %vm151_vm8, %v217_v52 }
 0x35a   :  { %v1160_v53 = vpop.eup %1159 }
 0x35b   :  { %v514_v57 = vpack.c.bf16 %v1160_v53, %v1160_v53  ;;  %v504_v59 = vsel %vm282_vm9, %v1160_v53, 0.0 }
 0x35c   :  { %505 = vadd.xlane.f32.xlu0 %v504_v59 }
 0x35d   :  { %1046 = vmatmul.msk.bf16.vlgmr.msra.gmra.mxu0 %vm282_vm9, %v514_v57 }
 0x35e   :  { %v449_v60 = vpop.xlane.xlu0 %448 }
 0x35f   :  { %v463_v61 = vsub.f32 %v1422_v63, %v449_v60  ;;  %v519_v62 = vld [vmem:[#allocation4 + $0x10] sm:$0xf] }
 0x360   :  { %v604_v1 = vsel %vm526_vm10, %v519_v62, 0 }
 0x361   :  { %v475_v3 = vmul.f32 1.442695, %v463_v61  ;;  %613 = vmatpush.bf16.msrb.mxu1 %v604_v1 }
 0x363   :  { %1161 = vpow2.f32 %v475_v3  ;;  %v1107_v3 = vld [vmem:[%s1556_s5 + $0x8] sm:$0xff] }
 0x364   :  { %502 = vadd.xlane.f32.xlu0 %v501_v56  ;;  %v1106_v56 = vld [vmem:[%s1556_s5] sm:$0xff]  ;;  %s1234_s5 = smov [#allocation6]  }
 0x369   :  { %v1162_v4 = vpop.eup %1161 }
 0x36a   :  { %v437_v5 = vpop.xlane.xlu1 %436  ;;  %v495_v6 = vsel %vm282_vm9, %v1162_v4, 0.0  ;;  %v511_v11 = vpack.c.bf16 %v1162_v4, %v1162_v4 }
 0x36b   :  { %v459_v55 = vsub.f32 %v1412_v54, %v437_v5 }
 0x36c   :  { %496 = vadd.xlane.f32.xlu0 %v495_v6 }
 0x36d   :  { %v467_v7 = vmul.f32 1.442695, %v459_v55 }
 0x36f   :  { %1163 = vpow2.f32 %v467_v7 }
 0x375   :  { %v1164_v8 = vpop.eup %1163 }
 0x376   :  { %v507_v63 = vpack.c.bf16 %v1164_v8, %v1164_v8  ;;  %v483_v9 = vsel %vm282_vm9, %v1164_v8, 0.0  ;;  %v1138_v8 = vld [vmem:[%s1557_s6] ss:$0 sm:$0xff]  ;;  %s1008_s6 = sshll.u32 %s1234_s5, 4  ;;  %s1009_s6 = int_to_ptr.vmem [resolvable:$true] %s1008_s6 }
 0x377   :  { %484 = vadd.xlane.f32.xlu1 %v483_v9 }
 0x378   :  { %1039 = vmatmul.msk.bf16.vlgmr.msra.gmra.mxu1 %vm282_vm9, %v507_v63 }
 0x379   :  { %771 = vmatpush.bf16.msra.mxu1 %v1107_v3 }
 0x37d   :  { %772 = vmatpush.bf16.msra.mxu1 %v1106_v56  ;;  %v1112_v56 = vld [vmem:[%s1562_s11 + $0x10] sm:$0xff] }
 0x388   :  { %1043 = vmatmul.msk.bf16.vlgmr.msrb.gmra.mxu1 %vm282_vm9, %v511_v11 }
 0x38e   :  { %v488_v12 = vpop.xlane.xlu1 %487 }
 0x396   :  { %v491_v13 = vpop.xlane.xlu1 %490 }
 0x397   :  { %1165 = vrcp.f32 %v491_v13 }
 0x398   :  { %1167 = vrcp.f32 %v488_v12 }
 0x39d   :  { %v1166_v14 = vpop.eup %1165 }
 0x39e   :  { %v577_v15 = vpop.f32.mrf.mxu3  ;;  %v1168_v54 = vpop.eup %1167 }
 0x39f   :  { %v558_v16 = vpop.f32.mrf.mxu2  ;;  %v686_v58 = vmul.f32 %v1166_v14, %v577_v15  ;;  %v500_v26 = vpop.xlane.xlu2 %499 }
 0x3a0   :  { %v685_v17 = vmul.f32 %v1168_v54, %v558_v16  ;;  %v596_v18 = vpop.f32.mrf.mxu0  ;;  %1169 = vrcp.f32 %v500_v26  ;;  %v494_v27 = vpop.xlane.xlu1 %493 }
 0x3a1   :  { %v701_v19 = vpack.c.bf16 %v686_v58, %v686_v58  ;;  %1171 = vrcp.f32 %v494_v27  ;;  %v1108_v27 = vld [vmem:[%s1560_s9] sm:$0xff] }
 0x3a2   :  { %v694_v20 = vpack.c.bf16 %v685_v17, %v685_v17 }
 0x3a3   :  { %703 = vrot.lane.b32.xlu2 %v701_v19, %s1231_s28 }
 0x3a4   :  { %696 = vrot.lane.b32.xlu1 %v694_v20, %s1232_s0 }
 0x3a6   :  { %v579_v21 = vpop.f32.mrf.mxu3  ;;  %v1170_v28 = vpop.eup %1169 }
 0x3a7   :  { %v560_v22 = vpop.f32.mrf.mxu2  ;;  %v1172_v33 = vpop.eup %1171 }
 0x3a8   :  { %v598_v23 = vpop.f32.mrf.mxu0  ;;  %v687_v34 = vmul.f32 %v1172_v33, %v596_v18 }
 0x3a9   :  { %v1109_v23 = vld [vmem:[%s1560_s9 + $0x8] sm:$0xff]  ;;  %s1010_s9 = sshll.u32 %s1564_s13, 4  ;;  %s1011_s9 = int_to_ptr.hbm [resolvable:$true] %s1010_s9 }
 0x3aa   :  { %v708_v37 = vpack.c.bf16 %v687_v34, %v687_v34  ;;  %867 = vmatpush.bf16.msra.mxu2 %v1109_v23 }
 0x3ae   :  { %868 = vmatpush.bf16.msra.mxu2 %v1108_v27 }
 0x3b8   :  { %v653_v24 = vpop.f32.mrf.mxu3 }
 0x3c0   :  { %v655_v25 = vpop.f32.mrf.mxu3 }
 0x3cf   :  { %v634_v29 = vpop.f32.mrf.mxu2  ;;  %v506_v30 = vpop.xlane.xlu0 %505 }
 0x3d0   :  { %v689_v31 = vmul.f32 %v1170_v28, %v634_v29 }
 0x3d2   :  { %v717_v32 = vpack.c.bf16 %v689_v31, %v689_v31 }
 0x3d4   :  { %719 = vrot.lane.b32.xlu0 %v717_v32, %s1232_s0 }
 0x3d7   :  { %v636_v35 = vpop.f32.mrf.mxu2  ;;  %v503_v36 = vpop.xlane.xlu0 %502 }
 0x3d8   :  { %1173 = vrcp.f32 %v503_v36 }
 0x3d9   :  { %1175 = vrcp.f32 %v506_v30 }
 0x3da   :  { %v672_v38 = vpop.f32.mrf.mxu0 }
 0x3dc   :  { %710 = vrot.lane.b32.xlu0 %v708_v37, %s1233_s29 }
 0x3de   :  { %v1174_v39 = vpop.eup %1173 }
 0x3df   :  { %v690_v40 = vmul.f32 %v1174_v39, %v653_v24  ;;  %v1176_v43 = vpop.eup %1175  ;;  %v497_v51 = vpop.xlane.xlu0 %496 }
 0x3e0   :  { %v691_v44 = vmul.f32 %v1176_v43, %v672_v38 }
 0x3e1   :  { %v723_v41 = vpack.c.bf16 %v690_v40, %v690_v40 }
 0x3e2   :  { %v674_v42 = vpop.f32.mrf.mxu0  ;;  %v729_v45 = vpack.c.bf16 %v691_v44, %v691_v44 }
 0x3e3   :  { %725 = vrot.lane.b32.xlu1 %v723_v41, %s1231_s28 }
 0x3ea   :  { %v485_v46 = vpop.xlane.xlu1 %484 }
 0x3eb   :  { %731 = vrot.lane.b32.xlu1 %v729_v45, %s1233_s29  ;;  %1177 = vrcp.f32 %v485_v46  ;;  %v1140_v46 = vld [vmem:[%s1559_s8] ss:$0 sm:$0xff] }
 0x3ec   :  { %1179 = vrcp.f32 %v497_v51 }
 0x3f1   :  { %v1178_v47 = vpop.eup %1177 }
 0x3f2   :  { %v1180_v53 = vpop.eup %1179 }
 0x3f5   :  { %v539_v48 = vpop.f32.mrf.mxu1 }
 0x3f6   :  { %v684_v49 = vmul.f32 %v1178_v47, %v539_v48 }
 0x3f8   :  { %v692_v50 = vpack.c.bf16 %v684_v49, %v684_v49 }
 0x3fa   :  { %693 = vst.msk [vmem:[#allocation5] sm:$0xf] %vm151_vm8, %v692_v50 }
 0x3fd   :  { %v541_v52 = vpop.f32.mrf.mxu1  ;;  %v704_v1 = vpop.permute.xlu2 %703 }
 0x405   :  { %v615_v57 = vpop.f32.mrf.mxu1 }
 0x406   :  { %v688_v59 = vmul.f32 %v1180_v53, %v615_v57  ;;  %v1117_v53 = vld [vmem:[%s1562_s11 + $0x38] sm:$0xff]  ;;  %v1116_v57 = vld [vmem:[%s1562_s11 + $0x30] sm:$0xff] }
 0x407   :  { %986 = vmatpush.bf16.msra.mxu3 %v1117_v53 }
 0x408   :  { %v715_v60 = vpack.c.bf16 %v688_v59, %v688_v59  ;;  %v1115_v59 = vld [vmem:[%s1562_s11 + $0x28] sm:$0xff] }
 0x40a   :  { %716 = vst.msk [vmem:[#allocation5 + $0x4] sm:$0xf] %vm151_vm8, %v715_v60  ;;  %v1114_v60 = vld [vmem:[%s1562_s11 + $0x20] sm:$0xff] }
 0x40b   :  { %987 = vmatpush.bf16.msra.mxu3 %v1116_v57 }
 0x40d   :  { %v617_v61 = vpop.f32.mrf.mxu1 }
 0x40e   :  { %v1141_v61 = vld [vmem:[%s1561_s10] ss:$0 sm:$0xff] }
 0x40f   :  { %988 = vmatpush.bf16.msra.mxu3 %v1115_v59 }
 0x413   :  { %989 = vmatpush.bf16.msra.mxu3 %v1114_v60 }
 0x416   :  { %v697_v62 = vpop.permute.xlu1 %696 }
 0x417   :  { %700 = vst.msk [vmem:[#allocation5] sm:$0xf] %vm699_vm11, %v697_v62  ;;  %v1113_v62 = vld [vmem:[%s1562_s11 + $0x18] sm:$0xff] }
 0x418   :  { %707 = vst.msk [vmem:[#allocation5] sm:$0xf] %vm706_vm12, %v704_v1  ;;  %990 = vmatpush.bf16.msra.mxu3 %v1113_v62 }
 0x41c   :  { %991 = vmatpush.bf16.msra.mxu3 %v1112_v56 }
 0x446   :  { %v720_v4 = vpop.permute.xlu0 %719 }
 0x447   :  { %722 = vst.msk [vmem:[#allocation5 + $0x4] sm:$0xf] %vm699_vm11, %v720_v4 }
 0x44e   :  { %v711_v5 = vpop.permute.xlu0 %710 }
 0x44f   :  { %714 = vst.msk [vmem:[#allocation5] sm:$0xf] %vm713_vm13, %v711_v5 }
 0x455   :  { %v726_v6 = vpop.permute.xlu1 %725 }
 0x456   :  { %728 = vst.msk [vmem:[#allocation5 + $0x4] sm:$0xf] %vm706_vm12, %v726_v6  ;;  %v1111_v6 = vld [vmem:[%s1562_s11 + $0x8] sm:$0xff] }
 0x457   :  { %992 = vmatpush.bf16.msra.mxu3 %v1111_v6 }
 0x45d   :  { %v732_v55 = vpop.permute.xlu1 %731 }
 0x45e   :  { %734 = vst.msk [vmem:[#allocation5 + $0x4] sm:$0xf] %vm713_vm13, %v732_v55 }
 0x465   :  { %v1105_v7 = vld [vmem:[#allocation5] sm:$0xff] }
 0x466   :  { %1059 = vmatmul.msk.bf16.vlgmr.msra.gmra.mxu1 %vm50_vm0, %v1105_v7 }
 0x4e3   :  { %v774_v63 = vpop.f32.mrf.mxu1 }
 0x4e4   :  { %v775_v9 = vadd.f32 %v1138_v8, %v774_v63 }
 0x4e6   :  { %v1483_v11 = vadd.f32 %v775_v9, %v1309_v0 }
 0x4e8   :  { %v783_v12 = vsel %vm50_vm0, %v1483_v11, 0.0 }
 0x4e9   :  { %784 = vadd.xlane.f32.xlu0 %v783_v12 }
 0x4eb   :  { %v776_v13 = vpop.f32.mrf.mxu1 }
 0x4ec   :  { %v777_v14 = vadd.f32 %v1138_v8, %v776_v13  ;;  %v1110_v8 = vld [vmem:[%s1562_s11] sm:$0xff] }
 0x4ed   :  { %993 = vmatpush.bf16.msra.mxu3 %v1110_v8 }
 0x4ee   :  { %v1488_v15 = vadd.f32 %v777_v14, %v1316_v2 }
 0x4f0   :  { %v786_v54 = vsel %vm50_vm0, %v1488_v15, 0.0 }
 0x4f1   :  { %787 = vadd.xlane.f32.xlu2 %v786_v54 }
 0x55c   :  { %v785_v16 = vpop.xlane.xlu0 %784 }
 0x55d   :  { %v789_v58 = vmul.f32 %v785_v16, %v1320_v10 }
 0x55f   :  { %v791_v17 = vsub.f32 %v1483_v11, %v789_v58 }
 0x561   :  { %v793_v0 = vmul.f32 %v791_v17, %v791_v17 }
 0x563   :  { %v795_v18 = vsel %vm50_vm0, %v793_v0, 0.0 }
 0x564   :  { %v788_v19 = vpop.xlane.xlu2 %787  ;;  %796 = vadd.xlane.f32.xlu1 %v795_v18 }
 0x565   :  { %v790_v20 = vmul.f32 %v788_v19, %v1320_v10 }
 0x567   :  { %v792_v21 = vsub.f32 %v1488_v15, %v790_v20 }
 0x569   :  { %v794_v2 = vmul.f32 %v792_v21, %v792_v21 }
 0x56b   :  { %v798_v22 = vsel %vm50_vm0, %v794_v2, 0.0 }
 0x56c   :  { %799 = vadd.xlane.f32.xlu0 %v798_v22 }
 0x5d7   :  { %v797_v24 = vpop.xlane.xlu1 %796 }
 0x5d8   :  { %v801_v25 = vmul.f32 %v797_v24, %v1320_v10 }
 0x5da   :  { %v803_v26 = vadd.f32 1e-05, %v801_v25 }
 0x5dc   :  { %1181 = vrsqrt.f32 %v803_v26  ;;  %vm811_vm15 = vweird.f32 %v803_v26 }
 0x5df   :  { %v800_v28 = vpop.xlane.xlu0 %799 }
 0x5e0   :  { %v802_v29 = vmul.f32 %v800_v28, %v1320_v10  ;;  %v1139_v10 = vld [vmem:[%s1558_s7] ss:$0 sm:$0xff] }
 0x5e2   :  { %v1182_v30 = vpop.eup %1181  ;;  %v804_v31 = vadd.f32 1e-05, %v802_v29 }
 0x5e3   :  { %v806_v32 = vmul.f32 %v1182_v30, %v803_v26  ;;  %vm812_vm14 = vweird.f32 %v1182_v30 }
 0x5e4   :  { %1183 = vrsqrt.f32 %v804_v31  ;;  %vm813_vm1 = vmor %vm811_vm15, %vm812_vm14  ;;  %vm821_vm3 = vweird.f32 %v804_v31 }
 0x5e5   :  { %v807_v33 = vmul.f32 %v1182_v30, %v806_v32 }
 0x5e7   :  { %v808_v34 = vmul.f32 0.5, %v807_v33 }
 0x5e9   :  { %v809_v35 = vsub.f32 1.5, %v808_v34 }
 0x5ea   :  { %v1184_v36 = vpop.eup %1183 }
 0x5eb   :  { %v810_v37 = vmul.f32 %v1182_v30, %v809_v35  ;;  %v816_v38 = vmul.f32 %v1184_v36, %v804_v31  ;;  %vm822_vm2 = vweird.f32 %v1184_v36 }
 0x5ec   :  { %vm823_vm4 = vmor %vm821_vm3, %vm822_vm2 }
 0x5ed   :  { %v817_v39 = vmul.f32 %v1184_v36, %v816_v38  ;;  %v814_v40 = vsel %vm813_vm1, %v1182_v30, %v810_v37 }
 0x5ee   :  { %v825_v43 = vmul.f32 %v814_v40, %v791_v17 }
 0x5ef   :  { %v818_v41 = vmul.f32 0.5, %v817_v39 }
 0x5f0   :  { %v830_v47 = vmul.f32 %v1139_v10, %v825_v43 }
 0x5f1   :  { %v819_v42 = vsub.f32 1.5, %v818_v41 }
 0x5f2   :  { %v835_v50 = vadd.f32 %v1140_v46, %v830_v47 }
 0x5f3   :  { %v820_v44 = vmul.f32 %v1184_v36, %v819_v42 }
 0x5f5   :  { %v824_v45 = vsel %vm823_vm4, %v1184_v36, %v820_v44  ;;  %v1142_v36 = vld [vmem:[%s1563_s12] ss:$0 sm:$0xff]  ;;  %s1235_s12 = smov 128  }
 0x5f6   :  { %v826_v48 = vmul.f32 %v824_v45, %v792_v21 }
 0x5f8   :  { %v831_v49 = vmul.f32 %v1139_v10, %v826_v48 }
 0x5fa   :  { %v836_v51 = vadd.f32 %v1140_v46, %v831_v49 }
 0x5fc   :  { %v837_v52 = vpack.c.bf16 %v836_v51, %v835_v50 }
 0x5fe   :  { %1068 = vmatmul.msk.bf16.vlgmr.msra.gmra.mxu2 %vm50_vm0, %v837_v52 }
 0x681   :  { %v870_v1 = vpop.f32.mrf.mxu2 }
 0x682   :  { %v871_v3 = vadd.f32 %v1141_v61, %v870_v1 }
 0x684   :  { %v1069_v4 = vmul.f32 -1.702, %v871_v3 }
 0x686   :  { %v879_v5 = vmul.f32 1.442695, %v1069_v4 }
 0x688   :  { %1185 = vpow2.f32 %v879_v5 }
 0x689   :  { %v872_v55 = vpop.f32.mrf.mxu2 }
 0x68a   :  { %v873_v7 = vadd.f32 %v1141_v61, %v872_v55 }
 0x68c   :  { %v1070_v63 = vmul.f32 -1.702, %v873_v7 }
 0x68e   :  { %v1186_v9 = vpop.eup %1185  ;;  %v881_v12 = vmul.f32 1.442695, %v1070_v63 }
 0x68f   :  { %v883_v13 = vadd.f32 1.0, %v1186_v9 }
 0x690   :  { %1187 = vpow2.f32 %v881_v12 }
 0x691   :  { %1189 = vrcp.f32 %v883_v13  ;;  %v896_v21 = vand.u32 2147483648, %v883_v13  ;;  %vm890_vm6 = vweird.f32 %v883_v13  ;;  %v894_v2 = vand.u32 2147483647, %v883_v13 }
 0x693   :  { %v897_v27 = vor.u32 1.1754944e-38, %v896_v21  ;;  %vm895_vm9 = vcmp.eq.f32.partialorder %v894_v2, 8.507059e+37 }
 0x696   :  { %v1188_v14 = vpop.eup %1187 }
 0x697   :  { %v1190_v54 = vpop.eup %1189  ;;  %v884_v16 = vadd.f32 1.0, %v1188_v14 }
 0x698   :  { %v886_v58 = vmul.f32 %v1190_v54, %v883_v13  ;;  %vm891_vm5 = vweird.f32 %v1190_v54 }
 0x699   :  { %1191 = vrcp.f32 %v884_v16  ;;  %vm892_vm7 = vmor %vm890_vm6, %vm891_vm5  ;;  %v911_v23 = vand.u32 2147483648, %v884_v16  ;;  %v909_v26 = vand.u32 2147483647, %v884_v16  ;;  %vm905_vm10 = vweird.f32 %v884_v16 }
 0x69a   :  { %v887_v17 = vsub.f32 1.0, %v886_v58 }
 0x69b   :  { %v912_v30 = vor.u32 1.1754944e-38, %v911_v23  ;;  %vm910_vm12 = vcmp.eq.f32.partialorder %v909_v26, 8.507059e+37 }
 0x69c   :  { %v888_v0 = vmul.f32 %v1190_v54, %v887_v17 }
 0x69e   :  { %v889_v19 = vadd.f32 %v1190_v54, %v888_v0 }
 0x69f   :  { %v1192_v18 = vpop.eup %1191 }
 0x6a0   :  { %v901_v20 = vmul.f32 %v1192_v18, %v884_v16  ;;  %v893_v24 = vsel %vm892_vm7, %v1190_v54, %v889_v19  ;;  %vm906_vm8 = vweird.f32 %v1192_v18 }
 0x6a1   :  { %v898_v29 = vsel %vm895_vm9, %v897_v27, %v893_v24  ;;  %vm907_vm11 = vmor %vm905_vm10, %vm906_vm8 }
 0x6a2   :  { %v902_v22 = vsub.f32 1.0, %v901_v20  ;;  %v915_v33 = vmul.f32 %v898_v29, %v871_v3 }
 0x6a4   :  { %v903_v25 = vmul.f32 %v1192_v18, %v902_v22 }
 0x6a6   :  { %v904_v28 = vadd.f32 %v1192_v18, %v903_v25 }
 0x6a8   :  { %v908_v31 = vsel %vm907_vm11, %v1192_v18, %v904_v28 }
 0x6a9   :  { %v913_v32 = vsel %vm910_vm12, %v912_v30, %v908_v31 }
 0x6aa   :  { %v916_v34 = vmul.f32 %v913_v32, %v873_v7 }
 0x6ac   :  { %v917_v35 = vpack.c.bf16 %v916_v34, %v915_v33 }
 0x6ae   :  { %994 = vmatmul.bf16.vlgmr.msra.gmra.mxu3 %v917_v35 }
 0x731   :  { %v995_v37 = vpop.f32.mrf.mxu3 }
 0x732   :  { %v996_v38 = vadd.f32 %v1142_v36, %v995_v37 }
 0x734   :  { %v1000_v39 = vadd.f32 %v996_v38, %v1483_v11 }
 0x736   :  { %1002 = vst.msk [vmem:[#allocation6] sm:$0xff] %vm50_vm0, %v1000_v39 }
 0x739   :  { %v997_v40 = vpop.f32.mrf.mxu3 }
 0x73a   :  { %v998_v41 = vadd.f32 %v1142_v36, %v997_v40 }
 0x73c   :  { %v1001_v42 = vadd.f32 %v998_v41, %v1488_v15 }
 0x73e   :  { %1003 = vst.msk [vmem:[#allocation6 + $0x8] sm:$0xff] %vm50_vm0, %v1001_v42 }
 0x73f   :  { %1016 = dma.vmem_to_hbm [thread:$0]  %s1009_s6, 256, %s1011_s9, [#allocation7], %s1235_s12, %s1235_s12, %s1232_s0  }
 0x740   :  { %1217 = dma.done.wait [#allocation7], 256  }
 0x741   :  { %1218 = vsyncadd [#allocation7], 4294967040 }
 0x742   :  { %1021 = vsyncpa [#allocation7], 1 }

</bundles_post_ra>
